<compile_context>
chip_gen: v7x
topology: tpu7x:2x2x1
jax: 0.10.0
libtpu: 0.0.40
codegen_flags: <defaults>
</compile_context>

<pallas_src>
import functools
import jax
import jax.numpy as jnp
from jax.experimental import pallas as pl
from jax.experimental.pallas import tpu as pltpu

# ---- small, module-consistent config -------------------------------------
VOCAB      = 65          # vocab_size = len(unique_chars)
N_EMBD     = 64          # n_embd (scaled down)
N_HEAD     = 4           # n_head
HEAD_SIZE  = N_EMBD // N_HEAD
BLOCK_SIZE = 16          # block_size (max context)
N_LAYER    = 2           # n_layer (scaled down)
BATCH      = 2
SEQ        = 8           # T <= BLOCK_SIZE
EPS        = 1e-5        # nn.LayerNorm default


# ---------------------------------------------------------------------------
# In-kernel helpers
# ---------------------------------------------------------------------------
def _layernorm(x, gamma, beta):
    mu = jnp.mean(x, axis=-1, keepdims=True)
    var = jnp.mean((x - mu) ** 2, axis=-1, keepdims=True)
    return (x - mu) * jax.lax.rsqrt(var + EPS) * gamma + beta


# ---------------------------------------------------------------------------
# Fully fused GPT forward kernel (all layers + final LN + lm_head)
# ---------------------------------------------------------------------------
def gpt_fused_kernel(x_ref, ln_ref, wqkv_ref, wproj_ref, w1_ref, w2_ref,
                     bcc_ref, b1_ref, lnf_ref, lmw_ref, lmb_ref, out_ref,
                     *, n_layer, n_head, head_size, batch, seq):
    C = n_head * head_size
    BT = batch * seq

    x = x_ref[...].astype(jnp.float32)                       # (BT, C)

    # causal mask, shared by all layers / heads
    row = jax.lax.broadcasted_iota(jnp.int32, (seq, seq), 0)
    col = jax.lax.broadcasted_iota(jnp.int32, (seq, seq), 1)
    causal = (col <= row)[None, :, :]                         # (1, T, T)
    scale = head_size ** -0.5

    for layer in range(n_layer):                              # static unroll
        lnp = ln_ref[layer]                                   # (4, C): g1,b1,g2,b2
        bcc = bcc_ref[layer]                                  # (2, C): b_proj, b_fc2
        w_qkv = wqkv_ref[layer]                               # (C, 3C)
        w_proj = wproj_ref[layer]                             # (C, C)

        # ---- multi-head causal self-attention (pre-LN) ----
        h = _layernorm(x, lnp[0:1, :], lnp[1:2, :])           # (BT, C)
        qkv = jnp.dot(h, w_qkv, preferred_element_type=jnp.float32)   # (BT, 3C)

        attn = jnp.zeros((BT, C), jnp.float32)
        for hi in range(n_head):                              # static unroll
            lo = hi * head_size
            hi_ = lo + head_size
            q = qkv[:, lo:hi_].reshape(batch, seq, head_size)            # (B,T,hs)
            k = qkv[:, C + lo:C + hi_].reshape(batch, seq, head_size)    # (B,T,hs)
            v = qkv[:, 2 * C + lo:2 * C + hi_].reshape(batch, seq, head_size)

            # batched over B, contracting last dims (no explicit transpose)
            wei = jnp.einsum('btd,bsd->bts', q, k,
                             preferred_element_type=jnp.float32) * scale  # (B,T,T)
            wei = jnp.where(causal, wei, -jnp.inf)
            wei = wei - jnp.max(wei, axis=-1, keepdims=True)
            p = jnp.exp(wei)
            p = p * pl.reciprocal(jnp.sum(p, axis=-1, keepdims=True), approx=True)
            oh = jnp.einsum('bts,bsd->btd', p, v,
                            preferred_element_type=jnp.float32)           # (B,T,hs)

            # accumulate straight into the output projection (no concat)
            attn = attn + jnp.dot(oh.reshape(BT, head_size),
                                  w_proj[lo:hi_, :],
                                  preferred_element_type=jnp.float32)     # (BT, C)
        x = x + attn + bcc[0:1, :]                            # residual 1

        # ---- feed-forward (pre-LN) ----
        h2 = _layernorm(x, lnp[2:3, :], lnp[3:4, :])
        ff = jnp.dot(h2, w1_ref[layer],
                     preferred_element_type=jnp.float32) + b1_ref[layer]  # (BT, 4C)
        ff = jnp.maximum(ff, 0.0)                             # ReLU
        x = x + jnp.dot(ff, w2_ref[layer],
                        preferred_element_type=jnp.float32) + bcc[1:2, :]  # residual 2

    # ---- final LayerNorm + lm_head (lane-dense padded output) ----
    h = _layernorm(x, lnf_ref[0:1, :], lnf_ref[1:2, :])
    logits = jnp.dot(h, lmw_ref[...],
                     preferred_element_type=jnp.float32) + lmb_ref[...]
    out_ref[...] = logits.astype(out_ref.dtype)               # (BT, VPAD)


# ---------------------------------------------------------------------------
# pallas_call wrapper: full model forward (targets=None path: returns logits)
# ---------------------------------------------------------------------------
def gpt_forward(tokens, params):
    B, T = tokens.shape
    C = N_EMBD
    # embedding gathers stay in plain JAX glue
    x = (params['tok_emb'][tokens] + params['pos_emb'][:T][None]).reshape(B * T, C)

    V = params['lm_w'].shape[1]
    vpad = ((V + 127) // 128) * 128                           # lane-dense logits
    lm_w_pad = jnp.pad(params['lm_w'], ((0, 0), (0, vpad - V)))
    lm_b_pad = jnp.pad(params['lm_b'], ((0, 0), (0, vpad - V)))

    kernel = functools.partial(gpt_fused_kernel, n_layer=N_LAYER, n_head=N_HEAD,
                               head_size=HEAD_SIZE, batch=B, seq=T)

    def full(shape):
        nd = len(shape)
        return pl.BlockSpec(shape, lambda i, _nd=nd: (0,) * _nd)

    in_arrays = (x, params['ln_stack'], params['w_qkv'], params['w_proj'],
                 params['w_fc1'], params['w_fc2'], params['b_cc'],
                 params['b_fc1'], params['lnf'], lm_w_pad, lm_b_pad)

    logits_pad = pl.pallas_call(
        kernel,
        out_shape=jax.ShapeDtypeStruct((B * T, vpad), jnp.float32),
        grid=(1,),
        in_specs=[full(a.shape) for a in in_arrays],
        out_specs=full((B * T, vpad)),
        compiler_params=pltpu.CompilerParams(dimension_semantics=("arbitrary",)),
    )(*in_arrays)

    return logits_pad.reshape(B, T, vpad)[:, :, :V]           # (B, T, VOCAB)


# ---------------------------------------------------------------------------
# Pure-JAX reference (same math, for sanity check)
# ---------------------------------------------------------------------------
def _ref_ln(x, g, b):
    mu = x.mean(-1, keepdims=True)
    var = ((x - mu) ** 2).mean(-1, keepdims=True)
    return (x - mu) / jnp.sqrt(var + EPS) * g + b


def ref_forward(tokens, params):
    B, T = tokens.shape
    C = N_EMBD
    x = params['tok_emb'][tokens] + params['pos_emb'][:T][None]
    mask = jnp.tril(jnp.ones((T, T), bool))
    for l in range(N_LAYER):
        g1, be1, g2, be2 = params['ln_stack'][l]
        h = _ref_ln(x, g1, be1)
        qkv = h @ params['w_qkv'][l]
        q, k, v = qkv[..., :C], qkv[..., C:2 * C], qkv[..., 2 * C:]
        split = lambda a: a.reshape(B, T, N_HEAD, HEAD_SIZE).transpose(0, 2, 1, 3)
        qh, kh, vh = split(q), split(k), split(v)
        wei = jnp.einsum('bhtd,bhsd->bhts', qh, kh) * HEAD_SIZE ** -0.5
        wei = jnp.where(mask, wei, -jnp.inf)
        wei = jax.nn.softmax(wei, axis=-1)
        o = jnp.einsum('bhts,bhsd->bhtd', wei, vh).transpose(0, 2, 1, 3).reshape(B, T, C)
        x = x + o @ params['w_proj'][l] + params['b_cc'][l, 0]
        h2 = _ref_ln(x, g2, be2)
        ff = jnp.maximum(h2 @ params['w_fc1'][l] + params['b_fc1'][l, 0], 0.0)
        x = x + ff @ params['w_fc2'][l] + params['b_cc'][l, 1]
    x = _ref_ln(x, params['lnf'][0], params['lnf'][1])
    return x @ params['lm_w'] + params['lm_b'][0]


# ---------------------------------------------------------------------------
# Deterministic parameter init (per-layer params stacked on a leading axis)
# ---------------------------------------------------------------------------
def init_params(key):
    C = N_EMBD
    ks = jax.random.split(key, 10)
    nrm = lambda k, shape, s=0.02: jax.random.normal(k, shape, jnp.float32) * s
    ln_one = jnp.stack([jnp.ones(C), jnp.zeros(C), jnp.ones(C), jnp.zeros(C)])
    return {
        'tok_emb': nrm(ks[0], (VOCAB, C)),
        'pos_emb': nrm(ks[1], (BLOCK_SIZE, C)),
        'ln_stack': jnp.tile(ln_one[None], (N_LAYER, 1, 1)).astype(jnp.float32),
        'w_qkv':  nrm(ks[2], (N_LAYER, C, 3 * C)),
        'w_proj': nrm(ks[3], (N_LAYER, C, C)),
        'w_fc1':  nrm(ks[4], (N_LAYER, C, 4 * C)),
        'w_fc2':  nrm(ks[5], (N_LAYER, 4 * C, C)),
        'b_cc':   nrm(ks[6], (N_LAYER, 2, C)),        # [b_proj, b_fc2]
        'b_fc1':  nrm(ks[7], (N_LAYER, 1, 4 * C)),
        'lnf':    jnp.stack([jnp.ones(C), jnp.zeros(C)]).astype(jnp.float32),
        'lm_w':   nrm(ks[8], (C, VOCAB)),
        'lm_b':   nrm(ks[9], (1, VOCAB)),
    }


if __name__ == "__main__":
    params = init_params(jax.random.PRNGKey(0))
    tokens = jax.random.randint(jax.random.PRNGKey(1), (BATCH, SEQ), 0, VOCAB,
                                dtype=jnp.int32)

    logits = jax.block_until_ready(gpt_forward(tokens, params))
    ref = ref_forward(tokens, params)

    assert logits.shape == (BATCH, SEQ, VOCAB)
    # tolerance slightly relaxed vs f32 reference because of the EUP approx
    # reciprocal in the softmax denominator.
    assert bool(jnp.allclose(logits, ref, atol=2e-3, rtol=2e-3)), "mismatch vs reference"

    print("KERNEL_OK")
</pallas_src>

<mosaic_0001>
module attributes {stable_mosaic.version = 11 : i64} {
  func.func @gpt_fused_kernel(%arg0: i32, %arg1: memref<16x64xf32, #tpu.memory_space<vmem>>, %arg2: memref<2x4x64xf32, #tpu.memory_space<vmem>>, %arg3: memref<2x64x192xf32, #tpu.memory_space<vmem>>, %arg4: memref<2x64x64xf32, #tpu.memory_space<vmem>>, %arg5: memref<2x64x256xf32, #tpu.memory_space<vmem>>, %arg6: memref<2x256x64xf32, #tpu.memory_space<vmem>>, %arg7: memref<2x2x64xf32, #tpu.memory_space<vmem>>, %arg8: memref<2x1x256xf32, #tpu.memory_space<vmem>>, %arg9: memref<2x64xf32, #tpu.memory_space<vmem>>, %arg10: memref<64x128xf32, #tpu.memory_space<vmem>>, %arg11: memref<1x128xf32, #tpu.memory_space<vmem>>, %arg12: memref<16x128xf32, #tpu.memory_space<vmem>>) attributes {dimension_semantics = [#tpu.dimension_semantics<arbitrary>], iteration_bounds = array<i64: 1>, scalar_prefetch = 0 : i64, scratch_operands = 0 : i64, tpu.core_type = #tpu.core_type<tc>, window_params = [{pipeline_mode = #tpu.pipeline_mode<synchronous>, transform_indices = @transform_0, window_bounds = array<i64: 16, 64>}, {pipeline_mode = #tpu.pipeline_mode<synchronous>, transform_indices = @transform_1, window_bounds = array<i64: 2, 4, 64>}, {pipeline_mode = #tpu.pipeline_mode<synchronous>, transform_indices = @transform_2, window_bounds = array<i64: 2, 64, 192>}, {pipeline_mode = #tpu.pipeline_mode<synchronous>, transform_indices = @transform_3, window_bounds = array<i64: 2, 64, 64>}, {pipeline_mode = #tpu.pipeline_mode<synchronous>, transform_indices = @transform_4, window_bounds = array<i64: 2, 64, 256>}, {pipeline_mode = #tpu.pipeline_mode<synchronous>, transform_indices = @transform_5, window_bounds = array<i64: 2, 256, 64>}, {pipeline_mode = #tpu.pipeline_mode<synchronous>, transform_indices = @transform_6, window_bounds = array<i64: 2, 2, 64>}, {pipeline_mode = #tpu.pipeline_mode<synchronous>, transform_indices = @transform_7, window_bounds = array<i64: 2, 1, 256>}, {pipeline_mode = #tpu.pipeline_mode<synchronous>, transform_indices = @transform_8, window_bounds = array<i64: 2, 64>}, {pipeline_mode = #tpu.pipeline_mode<synchronous>, transform_indices = @transform_9, window_bounds = array<i64: 64, 128>}, {pipeline_mode = #tpu.pipeline_mode<synchronous>, transform_indices = @transform_10, window_bounds = array<i64: 1, 128>}, {pipeline_mode = #tpu.pipeline_mode<synchronous>, transform_indices = @transform_11, window_bounds = array<i64: 16, 128>}]} {
    %c0 = arith.constant 0 : index
    %c0_0 = arith.constant 0 : index
    %0 = vector.load %arg1[%c0, %c0_0] : memref<16x64xf32, #tpu.memory_space<vmem>>, vector<16x64xf32>
    %1 = tpu.iota {dimensions = array<i32: 0>} : vector<8x8xi32>
    %2 = tpu.iota {dimensions = array<i32: 1>} : vector<8x8xi32>
    %3 = arith.cmpi sle, %2, %1 : vector<8x8xi32>
    %4 = vector.shape_cast %3 : vector<8x8xi1> to vector<1x8x8xi1>
    %c0_1 = arith.constant 0 : index
    %c0_2 = arith.constant 0 : index
    %c0_3 = arith.constant 0 : index
    %5 = vector.load %arg2[%c0_1, %c0_2, %c0_3] : memref<2x4x64xf32, #tpu.memory_space<vmem>>, vector<1x4x64xf32>
    %6 = vector.shape_cast %5 : vector<1x4x64xf32> to vector<4x64xf32>
    %c0_4 = arith.constant 0 : index
    %c0_5 = arith.constant 0 : index
    %c0_6 = arith.constant 0 : index
    %7 = vector.load %arg7[%c0_4, %c0_5, %c0_6] : memref<2x2x64xf32, #tpu.memory_space<vmem>>, vector<1x2x64xf32>
    %8 = vector.shape_cast %7 : vector<1x2x64xf32> to vector<2x64xf32>
    %c0_7 = arith.constant 0 : index
    %c0_8 = arith.constant 0 : index
    %c0_9 = arith.constant 0 : index
    %9 = vector.load %arg3[%c0_7, %c0_8, %c0_9] : memref<2x64x192xf32, #tpu.memory_space<vmem>>, vector<1x64x192xf32>
    %10 = vector.shape_cast %9 : vector<1x64x192xf32> to vector<64x192xf32>
    %c0_10 = arith.constant 0 : index
    %c0_11 = arith.constant 0 : index
    %c0_12 = arith.constant 0 : index
    %11 = vector.load %arg4[%c0_10, %c0_11, %c0_12] : memref<2x64x64xf32, #tpu.memory_space<vmem>>, vector<1x64x64xf32>
    %12 = vector.shape_cast %11 : vector<1x64x64xf32> to vector<64x64xf32>
    %13 = vector.extract_strided_slice %6 {offsets = [0, 0], sizes = [1, 64], strides = [1, 1]} : vector<4x64xf32> to vector<1x64xf32>
    %14 = vector.extract_strided_slice %6 {offsets = [1, 0], sizes = [1, 64], strides = [1, 1]} : vector<4x64xf32> to vector<1x64xf32>
    %cst = arith.constant dense<0.000000e+00> : vector<16xf32>
    %15 = vector.multi_reduction <add>, %0, %cst [1] : vector<16x64xf32> to vector<16xf32>
    %16 = vector.shape_cast %15 : vector<16xf32> to vector<16x1xf32>
    %cst_13 = arith.constant 6.400000e+01 : f32
    %17 = vector.broadcast %cst_13 : f32 to vector<16x1xf32>
    %18 = arith.divf %16, %17 : vector<16x1xf32>
    %19 = vector.broadcast %18 : vector<16x1xf32> to vector<16x64xf32>
    %20 = arith.subf %0, %19 : vector<16x64xf32>
    %21 = arith.mulf %20, %20 : vector<16x64xf32>
    %cst_14 = arith.constant dense<0.000000e+00> : vector<16xf32>
    %22 = vector.multi_reduction <add>, %21, %cst_14 [1] : vector<16x64xf32> to vector<16xf32>
    %23 = vector.shape_cast %22 : vector<16xf32> to vector<16x1xf32>
    %cst_15 = arith.constant 6.400000e+01 : f32
    %24 = vector.broadcast %cst_15 : f32 to vector<16x1xf32>
    %25 = arith.divf %23, %24 : vector<16x1xf32>
    %26 = vector.broadcast %18 : vector<16x1xf32> to vector<16x64xf32>
    %27 = arith.subf %0, %26 : vector<16x64xf32>
    %cst_16 = arith.constant 9.99999974E-6 : f32
    %28 = vector.broadcast %cst_16 : f32 to vector<16x1xf32>
    %29 = arith.addf %25, %28 : vector<16x1xf32>
    %30 = math.rsqrt %29 : vector<16x1xf32>
    %31 = vector.broadcast %30 : vector<16x1xf32> to vector<16x64xf32>
    %32 = arith.mulf %27, %31 : vector<16x64xf32>
    %33 = vector.broadcast %13 : vector<1x64xf32> to vector<16x64xf32>
    %34 = arith.mulf %32, %33 : vector<16x64xf32>
    %35 = vector.broadcast %14 : vector<1x64xf32> to vector<16x64xf32>
    %36 = arith.addf %34, %35 : vector<16x64xf32>
    %cst_17 = arith.constant dense<0.000000e+00> : vector<16x192xf32>
    %37 = tpu.matmul %36, %10, %cst_17 {dimension_numbers = #tpu.dot_dimension_numbers<[1], [0], [0], [1], [0, 0, 1, 1], [], []>} : vector<16x64xf32>, vector<64x192xf32>, vector<16x192xf32> -> vector<16x192xf32>
    %cst_18 = arith.constant 0.000000e+00 : f32
    %38 = vector.broadcast %cst_18 : f32 to vector<16x64xf32>
    %39 = vector.extract_strided_slice %37 {offsets = [0, 0], sizes = [16, 16], strides = [1, 1]} : vector<16x192xf32> to vector<16x16xf32>
    %40 = vector.shape_cast %39 : vector<16x16xf32> to vector<2x8x16xf32>
    %41 = vector.extract_strided_slice %37 {offsets = [0, 64], sizes = [16, 16], strides = [1, 1]} : vector<16x192xf32> to vector<16x16xf32>
    %42 = vector.shape_cast %41 : vector<16x16xf32> to vector<2x8x16xf32>
    %43 = vector.extract_strided_slice %37 {offsets = [0, 128], sizes = [16, 16], strides = [1, 1]} : vector<16x192xf32> to vector<16x16xf32>
    %44 = vector.shape_cast %43 : vector<16x16xf32> to vector<2x8x16xf32>
    "tpu.trace_start"() <{level = 10 : i32, message = "btd,bsd->bts"}> : () -> ()
    %cst_19 = arith.constant dense<0.000000e+00> : vector<2x8x8xf32>
    %45 = tpu.matmul %40, %42, %cst_19 {dimension_numbers = #tpu.dot_dimension_numbers<[2], [2], [1], [1], [0, 0, 0, 1, 1, 1], [0], [0]>} : vector<2x8x16xf32>, vector<2x8x16xf32>, vector<2x8x8xf32> -> vector<2x8x8xf32>
    "tpu.trace_stop"() : () -> ()
    %cst_20 = arith.constant 2.500000e-01 : f32
    %46 = vector.broadcast %cst_20 : f32 to vector<2x8x8xf32>
    %47 = arith.mulf %45, %46 : vector<2x8x8xf32>
    %cst_21 = arith.constant 0xFF800000 : f32
    %48 = vector.shape_cast %4 : vector<1x8x8xi1> to vector<1x8x8xi1>
    %49 = vector.broadcast %48 : vector<1x8x8xi1> to vector<2x8x8xi1>
    %50 = vector.broadcast %cst_21 : f32 to vector<2x8x8xf32>
    %51 = arith.select %49, %47, %50 : vector<2x8x8xi1>, vector<2x8x8xf32>
    %cst_22 = arith.constant dense<0xFF800000> : vector<2x8xf32>
    %52 = vector.multi_reduction <maximumf>, %51, %cst_22 [2] : vector<2x8x8xf32> to vector<2x8xf32>
    %53 = vector.shape_cast %52 : vector<2x8xf32> to vector<2x8x1xf32>
    %54 = vector.broadcast %53 : vector<2x8x1xf32> to vector<2x8x8xf32>
    %55 = arith.subf %51, %54 : vector<2x8x8xf32>
    %56 = math.exp %55 : vector<2x8x8xf32>
    %cst_23 = arith.constant dense<0.000000e+00> : vector<2x8xf32>
    %57 = vector.multi_reduction <add>, %56, %cst_23 [2] : vector<2x8x8xf32> to vector<2x8xf32>
    %58 = vector.shape_cast %57 : vector<2x8xf32> to vector<2x8x1xf32>
    %59 = tpu.reciprocal %58 {approx = true} : vector<2x8x1xf32> -> vector<2x8x1xf32>
    %60 = vector.broadcast %59 : vector<2x8x1xf32> to vector<2x8x8xf32>
    %61 = arith.mulf %56, %60 : vector<2x8x8xf32>
    "tpu.trace_start"() <{level = 10 : i32, message = "bts,bsd->btd"}> : () -> ()
    %cst_24 = arith.constant dense<0.000000e+00> : vector<2x8x16xf32>
    %62 = tpu.matmul %61, %44, %cst_24 {dimension_numbers = #tpu.dot_dimension_numbers<[2], [1], [1], [2], [0, 0, 0, 1, 1, 2], [0], [0]>} : vector<2x8x8xf32>, vector<2x8x16xf32>, vector<2x8x16xf32> -> vector<2x8x16xf32>
    "tpu.trace_stop"() : () -> ()
    %63 = vector.shape_cast %62 : vector<2x8x16xf32> to vector<16x16xf32>
    %64 = vector.extract_strided_slice %12 {offsets = [0, 0], sizes = [16, 64], strides = [1, 1]} : vector<64x64xf32> to vector<16x64xf32>
    %cst_25 = arith.constant dense<0.000000e+00> : vector<16x64xf32>
    %65 = tpu.matmul %63, %64, %cst_25 {dimension_numbers = #tpu.dot_dimension_numbers<[1], [0], [0], [1], [0, 0, 1, 1], [], []>} : vector<16x16xf32>, vector<16x64xf32>, vector<16x64xf32> -> vector<16x64xf32>
    %66 = arith.addf %38, %65 : vector<16x64xf32>
    %67 = vector.extract_strided_slice %37 {offsets = [0, 16], sizes = [16, 16], strides = [1, 1]} : vector<16x192xf32> to vector<16x16xf32>
    %68 = vector.shape_cast %67 : vector<16x16xf32> to vector<2x8x16xf32>
    %69 = vector.extract_strided_slice %37 {offsets = [0, 80], sizes = [16, 16], strides = [1, 1]} : vector<16x192xf32> to vector<16x16xf32>
    %70 = vector.shape_cast %69 : vector<16x16xf32> to vector<2x8x16xf32>
    %71 = vector.extract_strided_slice %37 {offsets = [0, 144], sizes = [16, 16], strides = [1, 1]} : vector<16x192xf32> to vector<16x16xf32>
    %72 = vector.shape_cast %71 : vector<16x16xf32> to vector<2x8x16xf32>
    "tpu.trace_start"() <{level = 10 : i32, message = "btd,bsd->bts"}> : () -> ()
    %cst_26 = arith.constant dense<0.000000e+00> : vector<2x8x8xf32>
    %73 = tpu.matmul %68, %70, %cst_26 {dimension_numbers = #tpu.dot_dimension_numbers<[2], [2], [1], [1], [0, 0, 0, 1, 1, 1], [0], [0]>} : vector<2x8x16xf32>, vector<2x8x16xf32>, vector<2x8x8xf32> -> vector<2x8x8xf32>
    "tpu.trace_stop"() : () -> ()
    %cst_27 = arith.constant 2.500000e-01 : f32
    %74 = vector.broadcast %cst_27 : f32 to vector<2x8x8xf32>
    %75 = arith.mulf %73, %74 : vector<2x8x8xf32>
    %cst_28 = arith.constant 0xFF800000 : f32
    %76 = vector.shape_cast %4 : vector<1x8x8xi1> to vector<1x8x8xi1>
    %77 = vector.broadcast %76 : vector<1x8x8xi1> to vector<2x8x8xi1>
    %78 = vector.broadcast %cst_28 : f32 to vector<2x8x8xf32>
    %79 = arith.select %77, %75, %78 : vector<2x8x8xi1>, vector<2x8x8xf32>
    %cst_29 = arith.constant dense<0xFF800000> : vector<2x8xf32>
    %80 = vector.multi_reduction <maximumf>, %79, %cst_29 [2] : vector<2x8x8xf32> to vector<2x8xf32>
    %81 = vector.shape_cast %80 : vector<2x8xf32> to vector<2x8x1xf32>
    %82 = vector.broadcast %81 : vector<2x8x1xf32> to vector<2x8x8xf32>
    %83 = arith.subf %79, %82 : vector<2x8x8xf32>
    %84 = math.exp %83 : vector<2x8x8xf32>
    %cst_30 = arith.constant dense<0.000000e+00> : vector<2x8xf32>
    %85 = vector.multi_reduction <add>, %84, %cst_30 [2] : vector<2x8x8xf32> to vector<2x8xf32>
    %86 = vector.shape_cast %85 : vector<2x8xf32> to vector<2x8x1xf32>
    %87 = tpu.reciprocal %86 {approx = true} : vector<2x8x1xf32> -> vector<2x8x1xf32>
    %88 = vector.broadcast %87 : vector<2x8x1xf32> to vector<2x8x8xf32>
    %89 = arith.mulf %84, %88 : vector<2x8x8xf32>
    "tpu.trace_start"() <{level = 10 : i32, message = "bts,bsd->btd"}> : () -> ()
    %cst_31 = arith.constant dense<0.000000e+00> : vector<2x8x16xf32>
    %90 = tpu.matmul %89, %72, %cst_31 {dimension_numbers = #tpu.dot_dimension_numbers<[2], [1], [1], [2], [0, 0, 0, 1, 1, 2], [0], [0]>} : vector<2x8x8xf32>, vector<2x8x16xf32>, vector<2x8x16xf32> -> vector<2x8x16xf32>
    "tpu.trace_stop"() : () -> ()
    %91 = vector.shape_cast %90 : vector<2x8x16xf32> to vector<16x16xf32>
    %92 = vector.extract_strided_slice %12 {offsets = [16, 0], sizes = [16, 64], strides = [1, 1]} : vector<64x64xf32> to vector<16x64xf32>
    %cst_32 = arith.constant dense<0.000000e+00> : vector<16x64xf32>
    %93 = tpu.matmul %91, %92, %cst_32 {dimension_numbers = #tpu.dot_dimension_numbers<[1], [0], [0], [1], [0, 0, 1, 1], [], []>} : vector<16x16xf32>, vector<16x64xf32>, vector<16x64xf32> -> vector<16x64xf32>
    %94 = arith.addf %66, %93 : vector<16x64xf32>
    %95 = vector.extract_strided_slice %37 {offsets = [0, 32], sizes = [16, 16], strides = [1, 1]} : vector<16x192xf32> to vector<16x16xf32>
    %96 = vector.shape_cast %95 : vector<16x16xf32> to vector<2x8x16xf32>
    %97 = vector.extract_strided_slice %37 {offsets = [0, 96], sizes = [16, 16], strides = [1, 1]} : vector<16x192xf32> to vector<16x16xf32>
    %98 = vector.shape_cast %97 : vector<16x16xf32> to vector<2x8x16xf32>
    %99 = vector.extract_strided_slice %37 {offsets = [0, 160], sizes = [16, 16], strides = [1, 1]} : vector<16x192xf32> to vector<16x16xf32>
    %100 = vector.shape_cast %99 : vector<16x16xf32> to vector<2x8x16xf32>
    "tpu.trace_start"() <{level = 10 : i32, message = "btd,bsd->bts"}> : () -> ()
    %cst_33 = arith.constant dense<0.000000e+00> : vector<2x8x8xf32>
    %101 = tpu.matmul %96, %98, %cst_33 {dimension_numbers = #tpu.dot_dimension_numbers<[2], [2], [1], [1], [0, 0, 0, 1, 1, 1], [0], [0]>} : vector<2x8x16xf32>, vector<2x8x16xf32>, vector<2x8x8xf32> -> vector<2x8x8xf32>
    "tpu.trace_stop"() : () -> ()
    %cst_34 = arith.constant 2.500000e-01 : f32
    %102 = vector.broadcast %cst_34 : f32 to vector<2x8x8xf32>
    %103 = arith.mulf %101, %102 : vector<2x8x8xf32>
    %cst_35 = arith.constant 0xFF800000 : f32
    %104 = vector.shape_cast %4 : vector<1x8x8xi1> to vector<1x8x8xi1>
    %105 = vector.broadcast %104 : vector<1x8x8xi1> to vector<2x8x8xi1>
    %106 = vector.broadcast %cst_35 : f32 to vector<2x8x8xf32>
    %107 = arith.select %105, %103, %106 : vector<2x8x8xi1>, vector<2x8x8xf32>
    %cst_36 = arith.constant dense<0xFF800000> : vector<2x8xf32>
    %108 = vector.multi_reduction <maximumf>, %107, %cst_36 [2] : vector<2x8x8xf32> to vector<2x8xf32>
    %109 = vector.shape_cast %108 : vector<2x8xf32> to vector<2x8x1xf32>
    %110 = vector.broadcast %109 : vector<2x8x1xf32> to vector<2x8x8xf32>
    %111 = arith.subf %107, %110 : vector<2x8x8xf32>
    %112 = math.exp %111 : vector<2x8x8xf32>
    %cst_37 = arith.constant dense<0.000000e+00> : vector<2x8xf32>
    %113 = vector.multi_reduction <add>, %112, %cst_37 [2] : vector<2x8x8xf32> to vector<2x8xf32>
    %114 = vector.shape_cast %113 : vector<2x8xf32> to vector<2x8x1xf32>
    %115 = tpu.reciprocal %114 {approx = true} : vector<2x8x1xf32> -> vector<2x8x1xf32>
    %116 = vector.broadcast %115 : vector<2x8x1xf32> to vector<2x8x8xf32>
    %117 = arith.mulf %112, %116 : vector<2x8x8xf32>
    "tpu.trace_start"() <{level = 10 : i32, message = "bts,bsd->btd"}> : () -> ()
    %cst_38 = arith.constant dense<0.000000e+00> : vector<2x8x16xf32>
    %118 = tpu.matmul %117, %100, %cst_38 {dimension_numbers = #tpu.dot_dimension_numbers<[2], [1], [1], [2], [0, 0, 0, 1, 1, 2], [0], [0]>} : vector<2x8x8xf32>, vector<2x8x16xf32>, vector<2x8x16xf32> -> vector<2x8x16xf32>
    "tpu.trace_stop"() : () -> ()
    %119 = vector.shape_cast %118 : vector<2x8x16xf32> to vector<16x16xf32>
    %120 = vector.extract_strided_slice %12 {offsets = [32, 0], sizes = [16, 64], strides = [1, 1]} : vector<64x64xf32> to vector<16x64xf32>
    %cst_39 = arith.constant dense<0.000000e+00> : vector<16x64xf32>
    %121 = tpu.matmul %119, %120, %cst_39 {dimension_numbers = #tpu.dot_dimension_numbers<[1], [0], [0], [1], [0, 0, 1, 1], [], []>} : vector<16x16xf32>, vector<16x64xf32>, vector<16x64xf32> -> vector<16x64xf32>
    %122 = arith.addf %94, %121 : vector<16x64xf32>
    %123 = vector.extract_strided_slice %37 {offsets = [0, 48], sizes = [16, 16], strides = [1, 1]} : vector<16x192xf32> to vector<16x16xf32>
    %124 = vector.shape_cast %123 : vector<16x16xf32> to vector<2x8x16xf32>
    %125 = vector.extract_strided_slice %37 {offsets = [0, 112], sizes = [16, 16], strides = [1, 1]} : vector<16x192xf32> to vector<16x16xf32>
    %126 = vector.shape_cast %125 : vector<16x16xf32> to vector<2x8x16xf32>
    %127 = vector.extract_strided_slice %37 {offsets = [0, 176], sizes = [16, 16], strides = [1, 1]} : vector<16x192xf32> to vector<16x16xf32>
    %128 = vector.shape_cast %127 : vector<16x16xf32> to vector<2x8x16xf32>
    "tpu.trace_start"() <{level = 10 : i32, message = "btd,bsd->bts"}> : () -> ()
    %cst_40 = arith.constant dense<0.000000e+00> : vector<2x8x8xf32>
    %129 = tpu.matmul %124, %126, %cst_40 {dimension_numbers = #tpu.dot_dimension_numbers<[2], [2], [1], [1], [0, 0, 0, 1, 1, 1], [0], [0]>} : vector<2x8x16xf32>, vector<2x8x16xf32>, vector<2x8x8xf32> -> vector<2x8x8xf32>
    "tpu.trace_stop"() : () -> ()
    %cst_41 = arith.constant 2.500000e-01 : f32
    %130 = vector.broadcast %cst_41 : f32 to vector<2x8x8xf32>
    %131 = arith.mulf %129, %130 : vector<2x8x8xf32>
    %cst_42 = arith.constant 0xFF800000 : f32
    %132 = vector.shape_cast %4 : vector<1x8x8xi1> to vector<1x8x8xi1>
    %133 = vector.broadcast %132 : vector<1x8x8xi1> to vector<2x8x8xi1>
    %134 = vector.broadcast %cst_42 : f32 to vector<2x8x8xf32>
    %135 = arith.select %133, %131, %134 : vector<2x8x8xi1>, vector<2x8x8xf32>
    %cst_43 = arith.constant dense<0xFF800000> : vector<2x8xf32>
    %136 = vector.multi_reduction <maximumf>, %135, %cst_43 [2] : vector<2x8x8xf32> to vector<2x8xf32>
    %137 = vector.shape_cast %136 : vector<2x8xf32> to vector<2x8x1xf32>
    %138 = vector.broadcast %137 : vector<2x8x1xf32> to vector<2x8x8xf32>
    %139 = arith.subf %135, %138 : vector<2x8x8xf32>
    %140 = math.exp %139 : vector<2x8x8xf32>
    %cst_44 = arith.constant dense<0.000000e+00> : vector<2x8xf32>
    %141 = vector.multi_reduction <add>, %140, %cst_44 [2] : vector<2x8x8xf32> to vector<2x8xf32>
    %142 = vector.shape_cast %141 : vector<2x8xf32> to vector<2x8x1xf32>
    %143 = tpu.reciprocal %142 {approx = true} : vector<2x8x1xf32> -> vector<2x8x1xf32>
    %144 = vector.broadcast %143 : vector<2x8x1xf32> to vector<2x8x8xf32>
    %145 = arith.mulf %140, %144 : vector<2x8x8xf32>
    "tpu.trace_start"() <{level = 10 : i32, message = "bts,bsd->btd"}> : () -> ()
    %cst_45 = arith.constant dense<0.000000e+00> : vector<2x8x16xf32>
    %146 = tpu.matmul %145, %128, %cst_45 {dimension_numbers = #tpu.dot_dimension_numbers<[2], [1], [1], [2], [0, 0, 0, 1, 1, 2], [0], [0]>} : vector<2x8x8xf32>, vector<2x8x16xf32>, vector<2x8x16xf32> -> vector<2x8x16xf32>
    "tpu.trace_stop"() : () -> ()
    %147 = vector.shape_cast %146 : vector<2x8x16xf32> to vector<16x16xf32>
    %148 = vector.extract_strided_slice %12 {offsets = [48, 0], sizes = [16, 64], strides = [1, 1]} : vector<64x64xf32> to vector<16x64xf32>
    %cst_46 = arith.constant dense<0.000000e+00> : vector<16x64xf32>
    %149 = tpu.matmul %147, %148, %cst_46 {dimension_numbers = #tpu.dot_dimension_numbers<[1], [0], [0], [1], [0, 0, 1, 1], [], []>} : vector<16x16xf32>, vector<16x64xf32>, vector<16x64xf32> -> vector<16x64xf32>
    %150 = arith.addf %122, %149 : vector<16x64xf32>
    %151 = arith.addf %0, %150 : vector<16x64xf32>
    %152 = vector.extract_strided_slice %8 {offsets = [0, 0], sizes = [1, 64], strides = [1, 1]} : vector<2x64xf32> to vector<1x64xf32>
    %153 = vector.broadcast %152 : vector<1x64xf32> to vector<16x64xf32>
    %154 = arith.addf %151, %153 : vector<16x64xf32>
    %155 = vector.extract_strided_slice %6 {offsets = [2, 0], sizes = [1, 64], strides = [1, 1]} : vector<4x64xf32> to vector<1x64xf32>
    %156 = vector.extract_strided_slice %6 {offsets = [3, 0], sizes = [1, 64], strides = [1, 1]} : vector<4x64xf32> to vector<1x64xf32>
    %cst_47 = arith.constant dense<0.000000e+00> : vector<16xf32>
    %157 = vector.multi_reduction <add>, %154, %cst_47 [1] : vector<16x64xf32> to vector<16xf32>
    %158 = vector.shape_cast %157 : vector<16xf32> to vector<16x1xf32>
    %cst_48 = arith.constant 6.400000e+01 : f32
    %159 = vector.broadcast %cst_48 : f32 to vector<16x1xf32>
    %160 = arith.divf %158, %159 : vector<16x1xf32>
    %161 = vector.broadcast %160 : vector<16x1xf32> to vector<16x64xf32>
    %162 = arith.subf %154, %161 : vector<16x64xf32>
    %163 = arith.mulf %162, %162 : vector<16x64xf32>
    %cst_49 = arith.constant dense<0.000000e+00> : vector<16xf32>
    %164 = vector.multi_reduction <add>, %163, %cst_49 [1] : vector<16x64xf32> to vector<16xf32>
    %165 = vector.shape_cast %164 : vector<16xf32> to vector<16x1xf32>
    %cst_50 = arith.constant 6.400000e+01 : f32
    %166 = vector.broadcast %cst_50 : f32 to vector<16x1xf32>
    %167 = arith.divf %165, %166 : vector<16x1xf32>
    %168 = vector.broadcast %160 : vector<16x1xf32> to vector<16x64xf32>
    %169 = arith.subf %154, %168 : vector<16x64xf32>
    %cst_51 = arith.constant 9.99999974E-6 : f32
    %170 = vector.broadcast %cst_51 : f32 to vector<16x1xf32>
    %171 = arith.addf %167, %170 : vector<16x1xf32>
    %172 = math.rsqrt %171 : vector<16x1xf32>
    %173 = vector.broadcast %172 : vector<16x1xf32> to vector<16x64xf32>
    %174 = arith.mulf %169, %173 : vector<16x64xf32>
    %175 = vector.broadcast %155 : vector<1x64xf32> to vector<16x64xf32>
    %176 = arith.mulf %174, %175 : vector<16x64xf32>
    %177 = vector.broadcast %156 : vector<1x64xf32> to vector<16x64xf32>
    %178 = arith.addf %176, %177 : vector<16x64xf32>
    %c0_52 = arith.constant 0 : index
    %c0_53 = arith.constant 0 : index
    %c0_54 = arith.constant 0 : index
    %179 = vector.load %arg5[%c0_52, %c0_53, %c0_54] : memref<2x64x256xf32, #tpu.memory_space<vmem>>, vector<1x64x256xf32>
    %180 = vector.shape_cast %179 : vector<1x64x256xf32> to vector<64x256xf32>
    %cst_55 = arith.constant dense<0.000000e+00> : vector<16x256xf32>
    %181 = tpu.matmul %178, %180, %cst_55 {dimension_numbers = #tpu.dot_dimension_numbers<[1], [0], [0], [1], [0, 0, 1, 1], [], []>} : vector<16x64xf32>, vector<64x256xf32>, vector<16x256xf32> -> vector<16x256xf32>
    %c0_56 = arith.constant 0 : index
    %c0_57 = arith.constant 0 : index
    %c0_58 = arith.constant 0 : index
    %182 = vector.load %arg8[%c0_56, %c0_57, %c0_58] : memref<2x1x256xf32, #tpu.memory_space<vmem>>, vector<1x1x256xf32>
    %183 = vector.shape_cast %182 : vector<1x1x256xf32> to vector<1x256xf32>
    %184 = vector.broadcast %183 : vector<1x256xf32> to vector<16x256xf32>
    %185 = arith.addf %181, %184 : vector<16x256xf32>
    %cst_59 = arith.constant 0.000000e+00 : f32
    %186 = vector.broadcast %cst_59 : f32 to vector<16x256xf32>
    %187 = arith.maximumf %185, %186 : vector<16x256xf32>
    %c0_60 = arith.constant 0 : index
    %c0_61 = arith.constant 0 : index
    %c0_62 = arith.constant 0 : index
    %188 = vector.load %arg6[%c0_60, %c0_61, %c0_62] : memref<2x256x64xf32, #tpu.memory_space<vmem>>, vector<1x256x64xf32>
    %189 = vector.shape_cast %188 : vector<1x256x64xf32> to vector<256x64xf32>
    %cst_63 = arith.constant dense<0.000000e+00> : vector<16x64xf32>
    %190 = tpu.matmul %187, %189, %cst_63 {dimension_numbers = #tpu.dot_dimension_numbers<[1], [0], [0], [1], [0, 0, 1, 1], [], []>} : vector<16x256xf32>, vector<256x64xf32>, vector<16x64xf32> -> vector<16x64xf32>
    %191 = arith.addf %154, %190 : vector<16x64xf32>
    %192 = vector.extract_strided_slice %8 {offsets = [1, 0], sizes = [1, 64], strides = [1, 1]} : vector<2x64xf32> to vector<1x64xf32>
    %193 = vector.broadcast %192 : vector<1x64xf32> to vector<16x64xf32>
    %194 = arith.addf %191, %193 : vector<16x64xf32>
    %c1 = arith.constant 1 : index
    %c0_64 = arith.constant 0 : index
    %c0_65 = arith.constant 0 : index
    %195 = vector.load %arg2[%c1, %c0_64, %c0_65] : memref<2x4x64xf32, #tpu.memory_space<vmem>>, vector<1x4x64xf32>
    %196 = vector.shape_cast %195 : vector<1x4x64xf32> to vector<4x64xf32>
    %c1_66 = arith.constant 1 : index
    %c0_67 = arith.constant 0 : index
    %c0_68 = arith.constant 0 : index
    %197 = vector.load %arg7[%c1_66, %c0_67, %c0_68] : memref<2x2x64xf32, #tpu.memory_space<vmem>>, vector<1x2x64xf32>
    %198 = vector.shape_cast %197 : vector<1x2x64xf32> to vector<2x64xf32>
    %c1_69 = arith.constant 1 : index
    %c0_70 = arith.constant 0 : index
    %c0_71 = arith.constant 0 : index
    %199 = vector.load %arg3[%c1_69, %c0_70, %c0_71] : memref<2x64x192xf32, #tpu.memory_space<vmem>>, vector<1x64x192xf32>
    %200 = vector.shape_cast %199 : vector<1x64x192xf32> to vector<64x192xf32>
    %c1_72 = arith.constant 1 : index
    %c0_73 = arith.constant 0 : index
    %c0_74 = arith.constant 0 : index
    %201 = vector.load %arg4[%c1_72, %c0_73, %c0_74] : memref<2x64x64xf32, #tpu.memory_space<vmem>>, vector<1x64x64xf32>
    %202 = vector.shape_cast %201 : vector<1x64x64xf32> to vector<64x64xf32>
    %203 = vector.extract_strided_slice %196 {offsets = [0, 0], sizes = [1, 64], strides = [1, 1]} : vector<4x64xf32> to vector<1x64xf32>
    %204 = vector.extract_strided_slice %196 {offsets = [1, 0], sizes = [1, 64], strides = [1, 1]} : vector<4x64xf32> to vector<1x64xf32>
    %cst_75 = arith.constant dense<0.000000e+00> : vector<16xf32>
    %205 = vector.multi_reduction <add>, %194, %cst_75 [1] : vector<16x64xf32> to vector<16xf32>
    %206 = vector.shape_cast %205 : vector<16xf32> to vector<16x1xf32>
    %cst_76 = arith.constant 6.400000e+01 : f32
    %207 = vector.broadcast %cst_76 : f32 to vector<16x1xf32>
    %208 = arith.divf %206, %207 : vector<16x1xf32>
    %209 = vector.broadcast %208 : vector<16x1xf32> to vector<16x64xf32>
    %210 = arith.subf %194, %209 : vector<16x64xf32>
    %211 = arith.mulf %210, %210 : vector<16x64xf32>
    %cst_77 = arith.constant dense<0.000000e+00> : vector<16xf32>
    %212 = vector.multi_reduction <add>, %211, %cst_77 [1] : vector<16x64xf32> to vector<16xf32>
    %213 = vector.shape_cast %212 : vector<16xf32> to vector<16x1xf32>
    %cst_78 = arith.constant 6.400000e+01 : f32
    %214 = vector.broadcast %cst_78 : f32 to vector<16x1xf32>
    %215 = arith.divf %213, %214 : vector<16x1xf32>
    %216 = vector.broadcast %208 : vector<16x1xf32> to vector<16x64xf32>
    %217 = arith.subf %194, %216 : vector<16x64xf32>
    %cst_79 = arith.constant 9.99999974E-6 : f32
    %218 = vector.broadcast %cst_79 : f32 to vector<16x1xf32>
    %219 = arith.addf %215, %218 : vector<16x1xf32>
    %220 = math.rsqrt %219 : vector<16x1xf32>
    %221 = vector.broadcast %220 : vector<16x1xf32> to vector<16x64xf32>
    %222 = arith.mulf %217, %221 : vector<16x64xf32>
    %223 = vector.broadcast %203 : vector<1x64xf32> to vector<16x64xf32>
    %224 = arith.mulf %222, %223 : vector<16x64xf32>
    %225 = vector.broadcast %204 : vector<1x64xf32> to vector<16x64xf32>
    %226 = arith.addf %224, %225 : vector<16x64xf32>
    %cst_80 = arith.constant dense<0.000000e+00> : vector<16x192xf32>
    %227 = tpu.matmul %226, %200, %cst_80 {dimension_numbers = #tpu.dot_dimension_numbers<[1], [0], [0], [1], [0, 0, 1, 1], [], []>} : vector<16x64xf32>, vector<64x192xf32>, vector<16x192xf32> -> vector<16x192xf32>
    %cst_81 = arith.constant 0.000000e+00 : f32
    %228 = vector.broadcast %cst_81 : f32 to vector<16x64xf32>
    %229 = vector.extract_strided_slice %227 {offsets = [0, 0], sizes = [16, 16], strides = [1, 1]} : vector<16x192xf32> to vector<16x16xf32>
    %230 = vector.shape_cast %229 : vector<16x16xf32> to vector<2x8x16xf32>
    %231 = vector.extract_strided_slice %227 {offsets = [0, 64], sizes = [16, 16], strides = [1, 1]} : vector<16x192xf32> to vector<16x16xf32>
    %232 = vector.shape_cast %231 : vector<16x16xf32> to vector<2x8x16xf32>
    %233 = vector.extract_strided_slice %227 {offsets = [0, 128], sizes = [16, 16], strides = [1, 1]} : vector<16x192xf32> to vector<16x16xf32>
    %234 = vector.shape_cast %233 : vector<16x16xf32> to vector<2x8x16xf32>
    "tpu.trace_start"() <{level = 10 : i32, message = "btd,bsd->bts"}> : () -> ()
    %cst_82 = arith.constant dense<0.000000e+00> : vector<2x8x8xf32>
    %235 = tpu.matmul %230, %232, %cst_82 {dimension_numbers = #tpu.dot_dimension_numbers<[2], [2], [1], [1], [0, 0, 0, 1, 1, 1], [0], [0]>} : vector<2x8x16xf32>, vector<2x8x16xf32>, vector<2x8x8xf32> -> vector<2x8x8xf32>
    "tpu.trace_stop"() : () -> ()
    %cst_83 = arith.constant 2.500000e-01 : f32
    %236 = vector.broadcast %cst_83 : f32 to vector<2x8x8xf32>
    %237 = arith.mulf %235, %236 : vector<2x8x8xf32>
    %cst_84 = arith.constant 0xFF800000 : f32
    %238 = vector.shape_cast %4 : vector<1x8x8xi1> to vector<1x8x8xi1>
    %239 = vector.broadcast %238 : vector<1x8x8xi1> to vector<2x8x8xi1>
    %240 = vector.broadcast %cst_84 : f32 to vector<2x8x8xf32>
    %241 = arith.select %239, %237, %240 : vector<2x8x8xi1>, vector<2x8x8xf32>
    %cst_85 = arith.constant dense<0xFF800000> : vector<2x8xf32>
    %242 = vector.multi_reduction <maximumf>, %241, %cst_85 [2] : vector<2x8x8xf32> to vector<2x8xf32>
    %243 = vector.shape_cast %242 : vector<2x8xf32> to vector<2x8x1xf32>
    %244 = vector.broadcast %243 : vector<2x8x1xf32> to vector<2x8x8xf32>
    %245 = arith.subf %241, %244 : vector<2x8x8xf32>
    %246 = math.exp %245 : vector<2x8x8xf32>
    %cst_86 = arith.constant dense<0.000000e+00> : vector<2x8xf32>
    %247 = vector.multi_reduction <add>, %246, %cst_86 [2] : vector<2x8x8xf32> to vector<2x8xf32>
    %248 = vector.shape_cast %247 : vector<2x8xf32> to vector<2x8x1xf32>
    %249 = tpu.reciprocal %248 {approx = true} : vector<2x8x1xf32> -> vector<2x8x1xf32>
    %250 = vector.broadcast %249 : vector<2x8x1xf32> to vector<2x8x8xf32>
    %251 = arith.mulf %246, %250 : vector<2x8x8xf32>
    "tpu.trace_start"() <{level = 10 : i32, message = "bts,bsd->btd"}> : () -> ()
    %cst_87 = arith.constant dense<0.000000e+00> : vector<2x8x16xf32>
    %252 = tpu.matmul %251, %234, %cst_87 {dimension_numbers = #tpu.dot_dimension_numbers<[2], [1], [1], [2], [0, 0, 0, 1, 1, 2], [0], [0]>} : vector<2x8x8xf32>, vector<2x8x16xf32>, vector<2x8x16xf32> -> vector<2x8x16xf32>
    "tpu.trace_stop"() : () -> ()
    %253 = vector.shape_cast %252 : vector<2x8x16xf32> to vector<16x16xf32>
    %254 = vector.extract_strided_slice %202 {offsets = [0, 0], sizes = [16, 64], strides = [1, 1]} : vector<64x64xf32> to vector<16x64xf32>
    %cst_88 = arith.constant dense<0.000000e+00> : vector<16x64xf32>
    %255 = tpu.matmul %253, %254, %cst_88 {dimension_numbers = #tpu.dot_dimension_numbers<[1], [0], [0], [1], [0, 0, 1, 1], [], []>} : vector<16x16xf32>, vector<16x64xf32>, vector<16x64xf32> -> vector<16x64xf32>
    %256 = arith.addf %228, %255 : vector<16x64xf32>
    %257 = vector.extract_strided_slice %227 {offsets = [0, 16], sizes = [16, 16], strides = [1, 1]} : vector<16x192xf32> to vector<16x16xf32>
    %258 = vector.shape_cast %257 : vector<16x16xf32> to vector<2x8x16xf32>
    %259 = vector.extract_strided_slice %227 {offsets = [0, 80], sizes = [16, 16], strides = [1, 1]} : vector<16x192xf32> to vector<16x16xf32>
    %260 = vector.shape_cast %259 : vector<16x16xf32> to vector<2x8x16xf32>
    %261 = vector.extract_strided_slice %227 {offsets = [0, 144], sizes = [16, 16], strides = [1, 1]} : vector<16x192xf32> to vector<16x16xf32>
    %262 = vector.shape_cast %261 : vector<16x16xf32> to vector<2x8x16xf32>
    "tpu.trace_start"() <{level = 10 : i32, message = "btd,bsd->bts"}> : () -> ()
    %cst_89 = arith.constant dense<0.000000e+00> : vector<2x8x8xf32>
    %263 = tpu.matmul %258, %260, %cst_89 {dimension_numbers = #tpu.dot_dimension_numbers<[2], [2], [1], [1], [0, 0, 0, 1, 1, 1], [0], [0]>} : vector<2x8x16xf32>, vector<2x8x16xf32>, vector<2x8x8xf32> -> vector<2x8x8xf32>
    "tpu.trace_stop"() : () -> ()
    %cst_90 = arith.constant 2.500000e-01 : f32
    %264 = vector.broadcast %cst_90 : f32 to vector<2x8x8xf32>
    %265 = arith.mulf %263, %264 : vector<2x8x8xf32>
    %cst_91 = arith.constant 0xFF800000 : f32
    %266 = vector.shape_cast %4 : vector<1x8x8xi1> to vector<1x8x8xi1>
    %267 = vector.broadcast %266 : vector<1x8x8xi1> to vector<2x8x8xi1>
    %268 = vector.broadcast %cst_91 : f32 to vector<2x8x8xf32>
    %269 = arith.select %267, %265, %268 : vector<2x8x8xi1>, vector<2x8x8xf32>
    %cst_92 = arith.constant dense<0xFF800000> : vector<2x8xf32>
    %270 = vector.multi_reduction <maximumf>, %269, %cst_92 [2] : vector<2x8x8xf32> to vector<2x8xf32>
    %271 = vector.shape_cast %270 : vector<2x8xf32> to vector<2x8x1xf32>
    %272 = vector.broadcast %271 : vector<2x8x1xf32> to vector<2x8x8xf32>
    %273 = arith.subf %269, %272 : vector<2x8x8xf32>
    %274 = math.exp %273 : vector<2x8x8xf32>
    %cst_93 = arith.constant dense<0.000000e+00> : vector<2x8xf32>
    %275 = vector.multi_reduction <add>, %274, %cst_93 [2] : vector<2x8x8xf32> to vector<2x8xf32>
    %276 = vector.shape_cast %275 : vector<2x8xf32> to vector<2x8x1xf32>
    %277 = tpu.reciprocal %276 {approx = true} : vector<2x8x1xf32> -> vector<2x8x1xf32>
    %278 = vector.broadcast %277 : vector<2x8x1xf32> to vector<2x8x8xf32>
    %279 = arith.mulf %274, %278 : vector<2x8x8xf32>
    "tpu.trace_start"() <{level = 10 : i32, message = "bts,bsd->btd"}> : () -> ()
    %cst_94 = arith.constant dense<0.000000e+00> : vector<2x8x16xf32>
    %280 = tpu.matmul %279, %262, %cst_94 {dimension_numbers = #tpu.dot_dimension_numbers<[2], [1], [1], [2], [0, 0, 0, 1, 1, 2], [0], [0]>} : vector<2x8x8xf32>, vector<2x8x16xf32>, vector<2x8x16xf32> -> vector<2x8x16xf32>
    "tpu.trace_stop"() : () -> ()
    %281 = vector.shape_cast %280 : vector<2x8x16xf32> to vector<16x16xf32>
    %282 = vector.extract_strided_slice %202 {offsets = [16, 0], sizes = [16, 64], strides = [1, 1]} : vector<64x64xf32> to vector<16x64xf32>
    %cst_95 = arith.constant dense<0.000000e+00> : vector<16x64xf32>
    %283 = tpu.matmul %281, %282, %cst_95 {dimension_numbers = #tpu.dot_dimension_numbers<[1], [0], [0], [1], [0, 0, 1, 1], [], []>} : vector<16x16xf32>, vector<16x64xf32>, vector<16x64xf32> -> vector<16x64xf32>
    %284 = arith.addf %256, %283 : vector<16x64xf32>
    %285 = vector.extract_strided_slice %227 {offsets = [0, 32], sizes = [16, 16], strides = [1, 1]} : vector<16x192xf32> to vector<16x16xf32>
    %286 = vector.shape_cast %285 : vector<16x16xf32> to vector<2x8x16xf32>
    %287 = vector.extract_strided_slice %227 {offsets = [0, 96], sizes = [16, 16], strides = [1, 1]} : vector<16x192xf32> to vector<16x16xf32>
    %288 = vector.shape_cast %287 : vector<16x16xf32> to vector<2x8x16xf32>
    %289 = vector.extract_strided_slice %227 {offsets = [0, 160], sizes = [16, 16], strides = [1, 1]} : vector<16x192xf32> to vector<16x16xf32>
    %290 = vector.shape_cast %289 : vector<16x16xf32> to vector<2x8x16xf32>
    "tpu.trace_start"() <{level = 10 : i32, message = "btd,bsd->bts"}> : () -> ()
    %cst_96 = arith.constant dense<0.000000e+00> : vector<2x8x8xf32>
    %291 = tpu.matmul %286, %288, %cst_96 {dimension_numbers = #tpu.dot_dimension_numbers<[2], [2], [1], [1], [0, 0, 0, 1, 1, 1], [0], [0]>} : vector<2x8x16xf32>, vector<2x8x16xf32>, vector<2x8x8xf32> -> vector<2x8x8xf32>
    "tpu.trace_stop"() : () -> ()
    %cst_97 = arith.constant 2.500000e-01 : f32
    %292 = vector.broadcast %cst_97 : f32 to vector<2x8x8xf32>
    %293 = arith.mulf %291, %292 : vector<2x8x8xf32>
    %cst_98 = arith.constant 0xFF800000 : f32
    %294 = vector.shape_cast %4 : vector<1x8x8xi1> to vector<1x8x8xi1>
    %295 = vector.broadcast %294 : vector<1x8x8xi1> to vector<2x8x8xi1>
    %296 = vector.broadcast %cst_98 : f32 to vector<2x8x8xf32>
    %297 = arith.select %295, %293, %296 : vector<2x8x8xi1>, vector<2x8x8xf32>
    %cst_99 = arith.constant dense<0xFF800000> : vector<2x8xf32>
    %298 = vector.multi_reduction <maximumf>, %297, %cst_99 [2] : vector<2x8x8xf32> to vector<2x8xf32>
    %299 = vector.shape_cast %298 : vector<2x8xf32> to vector<2x8x1xf32>
    %300 = vector.broadcast %299 : vector<2x8x1xf32> to vector<2x8x8xf32>
    %301 = arith.subf %297, %300 : vector<2x8x8xf32>
    %302 = math.exp %301 : vector<2x8x8xf32>
    %cst_100 = arith.constant dense<0.000000e+00> : vector<2x8xf32>
    %303 = vector.multi_reduction <add>, %302, %cst_100 [2] : vector<2x8x8xf32> to vector<2x8xf32>
    %304 = vector.shape_cast %303 : vector<2x8xf32> to vector<2x8x1xf32>
    %305 = tpu.reciprocal %304 {approx = true} : vector<2x8x1xf32> -> vector<2x8x1xf32>
    %306 = vector.broadcast %305 : vector<2x8x1xf32> to vector<2x8x8xf32>
    %307 = arith.mulf %302, %306 : vector<2x8x8xf32>
    "tpu.trace_start"() <{level = 10 : i32, message = "bts,bsd->btd"}> : () -> ()
    %cst_101 = arith.constant dense<0.000000e+00> : vector<2x8x16xf32>
    %308 = tpu.matmul %307, %290, %cst_101 {dimension_numbers = #tpu.dot_dimension_numbers<[2], [1], [1], [2], [0, 0, 0, 1, 1, 2], [0], [0]>} : vector<2x8x8xf32>, vector<2x8x16xf32>, vector<2x8x16xf32> -> vector<2x8x16xf32>
    "tpu.trace_stop"() : () -> ()
    %309 = vector.shape_cast %308 : vector<2x8x16xf32> to vector<16x16xf32>
    %310 = vector.extract_strided_slice %202 {offsets = [32, 0], sizes = [16, 64], strides = [1, 1]} : vector<64x64xf32> to vector<16x64xf32>
    %cst_102 = arith.constant dense<0.000000e+00> : vector<16x64xf32>
    %311 = tpu.matmul %309, %310, %cst_102 {dimension_numbers = #tpu.dot_dimension_numbers<[1], [0], [0], [1], [0, 0, 1, 1], [], []>} : vector<16x16xf32>, vector<16x64xf32>, vector<16x64xf32> -> vector<16x64xf32>
    %312 = arith.addf %284, %311 : vector<16x64xf32>
    %313 = vector.extract_strided_slice %227 {offsets = [0, 48], sizes = [16, 16], strides = [1, 1]} : vector<16x192xf32> to vector<16x16xf32>
    %314 = vector.shape_cast %313 : vector<16x16xf32> to vector<2x8x16xf32>
    %315 = vector.extract_strided_slice %227 {offsets = [0, 112], sizes = [16, 16], strides = [1, 1]} : vector<16x192xf32> to vector<16x16xf32>
    %316 = vector.shape_cast %315 : vector<16x16xf32> to vector<2x8x16xf32>
    %317 = vector.extract_strided_slice %227 {offsets = [0, 176], sizes = [16, 16], strides = [1, 1]} : vector<16x192xf32> to vector<16x16xf32>
    %318 = vector.shape_cast %317 : vector<16x16xf32> to vector<2x8x16xf32>
    "tpu.trace_start"() <{level = 10 : i32, message = "btd,bsd->bts"}> : () -> ()
    %cst_103 = arith.constant dense<0.000000e+00> : vector<2x8x8xf32>
    %319 = tpu.matmul %314, %316, %cst_103 {dimension_numbers = #tpu.dot_dimension_numbers<[2], [2], [1], [1], [0, 0, 0, 1, 1, 1], [0], [0]>} : vector<2x8x16xf32>, vector<2x8x16xf32>, vector<2x8x8xf32> -> vector<2x8x8xf32>
    "tpu.trace_stop"() : () -> ()
    %cst_104 = arith.constant 2.500000e-01 : f32
    %320 = vector.broadcast %cst_104 : f32 to vector<2x8x8xf32>
    %321 = arith.mulf %319, %320 : vector<2x8x8xf32>
    %cst_105 = arith.constant 0xFF800000 : f32
    %322 = vector.shape_cast %4 : vector<1x8x8xi1> to vector<1x8x8xi1>
    %323 = vector.broadcast %322 : vector<1x8x8xi1> to vector<2x8x8xi1>
    %324 = vector.broadcast %cst_105 : f32 to vector<2x8x8xf32>
    %325 = arith.select %323, %321, %324 : vector<2x8x8xi1>, vector<2x8x8xf32>
    %cst_106 = arith.constant dense<0xFF800000> : vector<2x8xf32>
    %326 = vector.multi_reduction <maximumf>, %325, %cst_106 [2] : vector<2x8x8xf32> to vector<2x8xf32>
    %327 = vector.shape_cast %326 : vector<2x8xf32> to vector<2x8x1xf32>
    %328 = vector.broadcast %327 : vector<2x8x1xf32> to vector<2x8x8xf32>
    %329 = arith.subf %325, %328 : vector<2x8x8xf32>
    %330 = math.exp %329 : vector<2x8x8xf32>
    %cst_107 = arith.constant dense<0.000000e+00> : vector<2x8xf32>
    %331 = vector.multi_reduction <add>, %330, %cst_107 [2] : vector<2x8x8xf32> to vector<2x8xf32>
    %332 = vector.shape_cast %331 : vector<2x8xf32> to vector<2x8x1xf32>
    %333 = tpu.reciprocal %332 {approx = true} : vector<2x8x1xf32> -> vector<2x8x1xf32>
    %334 = vector.broadcast %333 : vector<2x8x1xf32> to vector<2x8x8xf32>
    %335 = arith.mulf %330, %334 : vector<2x8x8xf32>
    "tpu.trace_start"() <{level = 10 : i32, message = "bts,bsd->btd"}> : () -> ()
    %cst_108 = arith.constant dense<0.000000e+00> : vector<2x8x16xf32>
    %336 = tpu.matmul %335, %318, %cst_108 {dimension_numbers = #tpu.dot_dimension_numbers<[2], [1], [1], [2], [0, 0, 0, 1, 1, 2], [0], [0]>} : vector<2x8x8xf32>, vector<2x8x16xf32>, vector<2x8x16xf32> -> vector<2x8x16xf32>
    "tpu.trace_stop"() : () -> ()
    %337 = vector.shape_cast %336 : vector<2x8x16xf32> to vector<16x16xf32>
    %338 = vector.extract_strided_slice %202 {offsets = [48, 0], sizes = [16, 64], strides = [1, 1]} : vector<64x64xf32> to vector<16x64xf32>
    %cst_109 = arith.constant dense<0.000000e+00> : vector<16x64xf32>
    %339 = tpu.matmul %337, %338, %cst_109 {dimension_numbers = #tpu.dot_dimension_numbers<[1], [0], [0], [1], [0, 0, 1, 1], [], []>} : vector<16x16xf32>, vector<16x64xf32>, vector<16x64xf32> -> vector<16x64xf32>
    %340 = arith.addf %312, %339 : vector<16x64xf32>
    %341 = arith.addf %194, %340 : vector<16x64xf32>
    %342 = vector.extract_strided_slice %198 {offsets = [0, 0], sizes = [1, 64], strides = [1, 1]} : vector<2x64xf32> to vector<1x64xf32>
    %343 = vector.broadcast %342 : vector<1x64xf32> to vector<16x64xf32>
    %344 = arith.addf %341, %343 : vector<16x64xf32>
    %345 = vector.extract_strided_slice %196 {offsets = [2, 0], sizes = [1, 64], strides = [1, 1]} : vector<4x64xf32> to vector<1x64xf32>
    %346 = vector.extract_strided_slice %196 {offsets = [3, 0], sizes = [1, 64], strides = [1, 1]} : vector<4x64xf32> to vector<1x64xf32>
    %cst_110 = arith.constant dense<0.000000e+00> : vector<16xf32>
    %347 = vector.multi_reduction <add>, %344, %cst_110 [1] : vector<16x64xf32> to vector<16xf32>
    %348 = vector.shape_cast %347 : vector<16xf32> to vector<16x1xf32>
    %cst_111 = arith.constant 6.400000e+01 : f32
    %349 = vector.broadcast %cst_111 : f32 to vector<16x1xf32>
    %350 = arith.divf %348, %349 : vector<16x1xf32>
    %351 = vector.broadcast %350 : vector<16x1xf32> to vector<16x64xf32>
    %352 = arith.subf %344, %351 : vector<16x64xf32>
    %353 = arith.mulf %352, %352 : vector<16x64xf32>
    %cst_112 = arith.constant dense<0.000000e+00> : vector<16xf32>
    %354 = vector.multi_reduction <add>, %353, %cst_112 [1] : vector<16x64xf32> to vector<16xf32>
    %355 = vector.shape_cast %354 : vector<16xf32> to vector<16x1xf32>
    %cst_113 = arith.constant 6.400000e+01 : f32
    %356 = vector.broadcast %cst_113 : f32 to vector<16x1xf32>
    %357 = arith.divf %355, %356 : vector<16x1xf32>
    %358 = vector.broadcast %350 : vector<16x1xf32> to vector<16x64xf32>
    %359 = arith.subf %344, %358 : vector<16x64xf32>
    %cst_114 = arith.constant 9.99999974E-6 : f32
    %360 = vector.broadcast %cst_114 : f32 to vector<16x1xf32>
    %361 = arith.addf %357, %360 : vector<16x1xf32>
    %362 = math.rsqrt %361 : vector<16x1xf32>
    %363 = vector.broadcast %362 : vector<16x1xf32> to vector<16x64xf32>
    %364 = arith.mulf %359, %363 : vector<16x64xf32>
    %365 = vector.broadcast %345 : vector<1x64xf32> to vector<16x64xf32>
    %366 = arith.mulf %364, %365 : vector<16x64xf32>
    %367 = vector.broadcast %346 : vector<1x64xf32> to vector<16x64xf32>
    %368 = arith.addf %366, %367 : vector<16x64xf32>
    %c1_115 = arith.constant 1 : index
    %c0_116 = arith.constant 0 : index
    %c0_117 = arith.constant 0 : index
    %369 = vector.load %arg5[%c1_115, %c0_116, %c0_117] : memref<2x64x256xf32, #tpu.memory_space<vmem>>, vector<1x64x256xf32>
    %370 = vector.shape_cast %369 : vector<1x64x256xf32> to vector<64x256xf32>
    %cst_118 = arith.constant dense<0.000000e+00> : vector<16x256xf32>
    %371 = tpu.matmul %368, %370, %cst_118 {dimension_numbers = #tpu.dot_dimension_numbers<[1], [0], [0], [1], [0, 0, 1, 1], [], []>} : vector<16x64xf32>, vector<64x256xf32>, vector<16x256xf32> -> vector<16x256xf32>
    %c1_119 = arith.constant 1 : index
    %c0_120 = arith.constant 0 : index
    %c0_121 = arith.constant 0 : index
    %372 = vector.load %arg8[%c1_119, %c0_120, %c0_121] : memref<2x1x256xf32, #tpu.memory_space<vmem>>, vector<1x1x256xf32>
    %373 = vector.shape_cast %372 : vector<1x1x256xf32> to vector<1x256xf32>
    %374 = vector.broadcast %373 : vector<1x256xf32> to vector<16x256xf32>
    %375 = arith.addf %371, %374 : vector<16x256xf32>
    %cst_122 = arith.constant 0.000000e+00 : f32
    %376 = vector.broadcast %cst_122 : f32 to vector<16x256xf32>
    %377 = arith.maximumf %375, %376 : vector<16x256xf32>
    %c1_123 = arith.constant 1 : index
    %c0_124 = arith.constant 0 : index
    %c0_125 = arith.constant 0 : index
    %378 = vector.load %arg6[%c1_123, %c0_124, %c0_125] : memref<2x256x64xf32, #tpu.memory_space<vmem>>, vector<1x256x64xf32>
    %379 = vector.shape_cast %378 : vector<1x256x64xf32> to vector<256x64xf32>
    %cst_126 = arith.constant dense<0.000000e+00> : vector<16x64xf32>
    %380 = tpu.matmul %377, %379, %cst_126 {dimension_numbers = #tpu.dot_dimension_numbers<[1], [0], [0], [1], [0, 0, 1, 1], [], []>} : vector<16x256xf32>, vector<256x64xf32>, vector<16x64xf32> -> vector<16x64xf32>
    %381 = arith.addf %344, %380 : vector<16x64xf32>
    %382 = vector.extract_strided_slice %198 {offsets = [1, 0], sizes = [1, 64], strides = [1, 1]} : vector<2x64xf32> to vector<1x64xf32>
    %383 = vector.broadcast %382 : vector<1x64xf32> to vector<16x64xf32>
    %384 = arith.addf %381, %383 : vector<16x64xf32>
    %c0_127 = arith.constant 0 : index
    %c0_128 = arith.constant 0 : index
    %385 = vector.load %arg9[%c0_127, %c0_128] : memref<2x64xf32, #tpu.memory_space<vmem>>, vector<1x64xf32>
    %c1_129 = arith.constant 1 : index
    %c0_130 = arith.constant 0 : index
    %386 = vector.load %arg9[%c1_129, %c0_130] : memref<2x64xf32, #tpu.memory_space<vmem>>, vector<1x64xf32>
    %cst_131 = arith.constant dense<0.000000e+00> : vector<16xf32>
    %387 = vector.multi_reduction <add>, %384, %cst_131 [1] : vector<16x64xf32> to vector<16xf32>
    %388 = vector.shape_cast %387 : vector<16xf32> to vector<16x1xf32>
    %cst_132 = arith.constant 6.400000e+01 : f32
    %389 = vector.broadcast %cst_132 : f32 to vector<16x1xf32>
    %390 = arith.divf %388, %389 : vector<16x1xf32>
    %391 = vector.broadcast %390 : vector<16x1xf32> to vector<16x64xf32>
    %392 = arith.subf %384, %391 : vector<16x64xf32>
    %393 = arith.mulf %392, %392 : vector<16x64xf32>
    %cst_133 = arith.constant dense<0.000000e+00> : vector<16xf32>
    %394 = vector.multi_reduction <add>, %393, %cst_133 [1] : vector<16x64xf32> to vector<16xf32>
    %395 = vector.shape_cast %394 : vector<16xf32> to vector<16x1xf32>
    %cst_134 = arith.constant 6.400000e+01 : f32
    %396 = vector.broadcast %cst_134 : f32 to vector<16x1xf32>
    %397 = arith.divf %395, %396 : vector<16x1xf32>
    %398 = vector.broadcast %390 : vector<16x1xf32> to vector<16x64xf32>
    %399 = arith.subf %384, %398 : vector<16x64xf32>
    %cst_135 = arith.constant 9.99999974E-6 : f32
    %400 = vector.broadcast %cst_135 : f32 to vector<16x1xf32>
    %401 = arith.addf %397, %400 : vector<16x1xf32>
    %402 = math.rsqrt %401 : vector<16x1xf32>
    %403 = vector.broadcast %402 : vector<16x1xf32> to vector<16x64xf32>
    %404 = arith.mulf %399, %403 : vector<16x64xf32>
    %405 = vector.broadcast %385 : vector<1x64xf32> to vector<16x64xf32>
    %406 = arith.mulf %404, %405 : vector<16x64xf32>
    %407 = vector.broadcast %386 : vector<1x64xf32> to vector<16x64xf32>
    %408 = arith.addf %406, %407 : vector<16x64xf32>
    %c0_136 = arith.constant 0 : index
    %c0_137 = arith.constant 0 : index
    %409 = vector.load %arg10[%c0_136, %c0_137] : memref<64x128xf32, #tpu.memory_space<vmem>>, vector<64x128xf32>
    %cst_138 = arith.constant dense<0.000000e+00> : vector<16x128xf32>
    %410 = tpu.matmul %408, %409, %cst_138 {dimension_numbers = #tpu.dot_dimension_numbers<[1], [0], [0], [1], [0, 0, 1, 1], [], []>} : vector<16x64xf32>, vector<64x128xf32>, vector<16x128xf32> -> vector<16x128xf32>
    %c0_139 = arith.constant 0 : index
    %c0_140 = arith.constant 0 : index
    %411 = vector.load %arg11[%c0_139, %c0_140] : memref<1x128xf32, #tpu.memory_space<vmem>>, vector<1x128xf32>
    %412 = vector.broadcast %411 : vector<1x128xf32> to vector<16x128xf32>
    %413 = arith.addf %410, %412 : vector<16x128xf32>
    %c0_141 = arith.constant 0 : index
    %c0_142 = arith.constant 0 : index
    %414 = vector.load %arg12[%c0_141, %c0_142] : memref<16x128xf32, #tpu.memory_space<vmem>>, vector<16x128xf32>
    tpu.vector_store %arg12[%c0_141, %c0_142], %413 {strides = array<i32>} : memref<16x128xf32, #tpu.memory_space<vmem>>, vector<16x128xf32>,
    return
  }
  func.func @transform_0(%arg0: i32) -> (i32, i32) {
    %c0_i32 = arith.constant 0 : i32
    %c0_i32_0 = arith.constant 0 : i32
    %c0_i32_1 = arith.constant 0 : i32
    return %c0_i32, %c0_i32_0 : i32, i32
  }
  func.func @transform_1(%arg0: i32) -> (i32, i32, i32) {
    %c0_i32 = arith.constant 0 : i32
    %c0_i32_0 = arith.constant 0 : i32
    %c0_i32_1 = arith.constant 0 : i32
    %c0_i32_2 = arith.constant 0 : i32
    return %c0_i32, %c0_i32_0, %c0_i32_1 : i32, i32, i32
  }
  func.func @transform_2(%arg0: i32) -> (i32, i32, i32) {
    %c0_i32 = arith.constant 0 : i32
    %c0_i32_0 = arith.constant 0 : i32
    %c0_i32_1 = arith.constant 0 : i32
    %c0_i32_2 = arith.constant 0 : i32
    return %c0_i32, %c0_i32_0, %c0_i32_1 : i32, i32, i32
  }
  func.func @transform_3(%arg0: i32) -> (i32, i32, i32) {
    %c0_i32 = arith.constant 0 : i32
    %c0_i32_0 = arith.constant 0 : i32
    %c0_i32_1 = arith.constant 0 : i32
    %c0_i32_2 = arith.constant 0 : i32
    return %c0_i32, %c0_i32_0, %c0_i32_1 : i32, i32, i32
  }
  func.func @transform_4(%arg0: i32) -> (i32, i32, i32) {
    %c0_i32 = arith.constant 0 : i32
    %c0_i32_0 = arith.constant 0 : i32
    %c0_i32_1 = arith.constant 0 : i32
    %c0_i32_2 = arith.constant 0 : i32
    return %c0_i32, %c0_i32_0, %c0_i32_1 : i32, i32, i32
  }
  func.func @transform_5(%arg0: i32) -> (i32, i32, i32) {
    %c0_i32 = arith.constant 0 : i32
    %c0_i32_0 = arith.constant 0 : i32
    %c0_i32_1 = arith.constant 0 : i32
    %c0_i32_2 = arith.constant 0 : i32
    return %c0_i32, %c0_i32_0, %c0_i32_1 : i32, i32, i32
  }
  func.func @transform_6(%arg0: i32) -> (i32, i32, i32) {
    %c0_i32 = arith.constant 0 : i32
    %c0_i32_0 = arith.constant 0 : i32
    %c0_i32_1 = arith.constant 0 : i32
    %c0_i32_2 = arith.constant 0 : i32
    return %c0_i32, %c0_i32_0, %c0_i32_1 : i32, i32, i32
  }
  func.func @transform_7(%arg0: i32) -> (i32, i32, i32) {
    %c0_i32 = arith.constant 0 : i32
    %c0_i32_0 = arith.constant 0 : i32
    %c0_i32_1 = arith.constant 0 : i32
    %c0_i32_2 = arith.constant 0 : i32
    return %c0_i32, %c0_i32_0, %c0_i32_1 : i32, i32, i32
  }
  func.func @transform_8(%arg0: i32) -> (i32, i32) {
    %c0_i32 = arith.constant 0 : i32
    %c0_i32_0 = arith.constant 0 : i32
    %c0_i32_1 = arith.constant 0 : i32
    return %c0_i32, %c0_i32_0 : i32, i32
  }
  func.func @transform_9(%arg0: i32) -> (i32, i32) {
    %c0_i32 = arith.constant 0 : i32
    %c0_i32_0 = arith.constant 0 : i32
    %c0_i32_1 = arith.constant 0 : i32
    return %c0_i32, %c0_i32_0 : i32, i32
  }
  func.func @transform_10(%arg0: i32) -> (i32, i32) {
    %c0_i32 = arith.constant 0 : i32
    %c0_i32_0 = arith.constant 0 : i32
    %c0_i32_1 = arith.constant 0 : i32
    return %c0_i32, %c0_i32_0 : i32, i32
  }
  func.func @transform_11(%arg0: i32) -> (i32, i32) {
    %c0_i32 = arith.constant 0 : i32
    %c0_i32_0 = arith.constant 0 : i32
    %c0_i32_1 = arith.constant 0 : i32
    return %c0_i32, %c0_i32_0 : i32, i32
  }
}

</mosaic_0001>

<bundles_post_ra>
// kernel: tpu_custom_call.1
= control target key start
LH: loop header
LB: loop body
LE: loop exit
PB: predicated region body
PF: predicated region fallthrough
CT: control target
= control target key end

     0   :  { %vm72_vm0 = vcmask 523264   ;;  %s6321_s0 = inlined_call_operand.vmem [shape: f32[16,64], index: 0, kind: input, shape index: {}]   ;;  %s6322_s1 = inlined_call_operand.vmem [shape: f32[2,4,64], index: 1, kind: input, shape index: {}]   ;;  %s6323_s2 = inlined_call_operand.vmem [shape: f32[2,64,192], index: 2, kind: input, shape index: {}]   ;;  %s6324_s3 = inlined_call_operand.vmem [shape: f32[2,64,64], index: 3, kind: input, shape index: {}]   ;;  %s6325_s4 = inlined_call_operand.vmem [shape: f32[2,64,256], index: 4, kind: input, shape index: {}]   ;;  %s6326_s5 = inlined_call_operand.vmem [shape: f32[2,256,64], index: 5, kind: input, shape index: {}]   ;;  %s6327_s6 = inlined_call_operand.vmem [shape: f32[2,2,64], index: 6, kind: input, shape index: {}]   ;;  %s6328_s7 = inlined_call_operand.vmem [shape: f32[2,1,256], index: 7, kind: input, shape index: {}]   ;;  %s6329_s8 = inlined_call_operand.vmem [shape: f32[2,64], index: 8, kind: input, shape index: {}]   ;;  %s6330_s9 = inlined_call_operand.vmem [shape: f32[64,128], index: 9, kind: input, shape index: {}]   ;;  %s6331_s10 = inlined_call_operand.vmem [shape: f32[1,128], index: 10, kind: input, shape index: {}]   ;;  %s6332_s11 = inlined_call_operand.hbm [shape: f32[16,128], index: 11, kind: output, shape index: {}]  }
   0x1   :  { %v5327_v0 = vld [vmem:[%s6321_s0] sm:$0xff]  ;;  %v5332_v1 = vld [vmem:[%s6321_s0 + $0x8] sm:$0xff] }
   0x2   :  { %16 = vsyncpa [#allocation3], 0  ;;  %v73_v2 = vsel %vm72_vm0, %v5327_v0, 0.0  ;;  %v76_v3 = vsel %vm72_vm0, %v5332_v1, 0.0  ;;  %v49_v14 = vld [vmem:[%s6323_s2 + $0x8] sm:$0xff]  ;;  %v51_v15 = vld [vmem:[%s6323_s2 + $0x18] sm:$0xff]  ;;  %v41_v41 = vlaneseq }
   0x3   :  { %74 = vadd.xlane.f32.xlu0 %v73_v2  ;;  %v4944_v16 = vpack.c.bf16 %v51_v15, %v49_v14  ;;  %v48_v17 = vld [vmem:[%s6323_s2] sm:$0xff]  ;;  %v50_v18 = vld [vmem:[%s6323_s2 + $0x10] sm:$0xff]  ;;  %v53_v20 = vld [vmem:[%s6323_s2 + $0x28] sm:$0xff]  ;;  %v5252_v33 = vmov 0.0   ;;  %vm5253_vm1 = vmmov 0   ;;  %s5254_s15 = smov 64  }
   0x4   :  { %v4946_v19 = vpack.c.bf16 %v50_v18, %v48_v17  ;;  %v55_v21 = vld [vmem:[%s6323_s2 + $0x38] sm:$0xff]  ;;  %v52_v23 = vld [vmem:[%s6323_s2 + $0x20] sm:$0xff]  ;;  %v54_v24 = vld [vmem:[%s6323_s2 + $0x30] sm:$0xff]  ;;  %182 = vmatprep.mubr.f32.mxu0 %v5252_v33  ;;  %4714 = vmatprep.subr.mxu1 %v5252_v33  ;;  %v5393_v45 = vshrl.u32 %v41_v41, 7  ;;  %s5255_s16 = smov 48   ;;  %s5256_s17 = smov 112  }
   0x5   :  { %4945 = vmatprep.subr.bf16.mxu0 %v4944_v16  ;;  %v4948_v22 = vpack.c.bf16 %v55_v21, %v53_v20  ;;  %v4950_v25 = vpack.c.bf16 %v54_v24, %v52_v23  ;;  %v57_v26 = vld [vmem:[%s6323_s2 + $0x48] sm:$0xff]  ;;  %v59_v27 = vld [vmem:[%s6323_s2 + $0x58] sm:$0xff]  ;;  %v56_v28 = vld [vmem:[%s6323_s2 + $0x40] sm:$0xff]  ;;  %4716 = vmatprep.mubr.msk.f32.mxu1 %vm5253_vm1, %v5252_v33  ;;  %vm198_vm2 = vcmask 130048   ;;  %vm356_vm4 = vcmask 64512   ;;  %s5257_s18 = smov 32  }
   0x6   :  { %4947 = vmatpush1.bf16.msra.mxu0 %v4946_v19  ;;  %v4952_v29 = vpack.c.bf16 %v59_v27, %v57_v26  ;;  %v58_v30 = vld [vmem:[%s6323_s2 + $0x50] sm:$0xff]  ;;  %v61_v31 = vld [vmem:[%s6323_s2 + $0x68] sm:$0xff]  ;;  %v63_v32 = vld [vmem:[%s6323_s2 + $0x78] sm:$0xff]  ;;  %v5396_v47 = vsub.s32 0, %v5393_v45  ;;  %v5404_v49 = vsub.s32 1, %v5393_v45  ;;  %s5258_s19 = smov 96  }
   0x7   :  { %77 = vadd.xlane.f32.xlu0 %v76_v3  ;;  %4949 = vmatprep.subr.bf16.mxu0 %v4948_v22  ;;  %v4954_v34 = vpack.c.bf16 %v58_v30, %v56_v28  ;;  %v4956_v35 = vpack.c.bf16 %v63_v32, %v61_v31  ;;  %v60_v36 = vld [vmem:[%s6323_s2 + $0x60] sm:$0xff]  ;;  %v62_v37 = vld [vmem:[%s6323_s2 + $0x70] sm:$0xff]  ;;  %s5259_s20 = smov 16   ;;  %s5260_s0 = smov 80  }
   0x8   :  { %v4958_v38 = vpack.c.bf16 %v62_v37, %v60_v36  ;;  %v5401_v48 = vld [vmem:[%s6322_s1] sm:$0xf]  ;;  %s5261_s13 = smov [#allocation2]  }
   0x9   :  { %v103_v50 = vrot.slane %v5401_v48, %v5396_v47  ;;  %v109_v53 = vrot.slane %v5401_v48, %v5404_v49 }
   0xa   :  { %4951 = vmatpush1.bf16.msra.mxu0 %v4950_v25 }
   0xb   :  { %4953 = vmatprep.subr.bf16.mxu0 %v4952_v29 }
   0xe   :  { %4955 = vmatpush1.bf16.msra.mxu0 %v4954_v34 }
   0xf   :  { %4957 = vmatprep.subr.bf16.mxu0 %v4956_v35 }
  0x12   :  { %4959 = vmatpush1.bf16.msra.mxu0 %v4958_v38 }
  0x13   :  { %4709 = vmatprep.subr.mxu0 %v5252_v33 }
  0x90   :  { %v75_v4 = vpop.xlane.xlu0 %74 }
  0x91   :  { %v80_v5 = vmul.f32 0.015625, %v75_v4 }
  0x93   :  { %v82_v6 = vsub.f32 %v5327_v0, %v80_v5 }
  0x94   :  { %v78_v7 = vpop.xlane.xlu0 %77 }
  0x95   :  { %v81_v8 = vmul.f32 0.015625, %v78_v7  ;;  %v84_v9 = vmul.f32 %v82_v6, %v82_v6 }
  0x97   :  { %v83_v10 = vsub.f32 %v5332_v1, %v81_v8  ;;  %v86_v11 = vsel %vm72_vm0, %v84_v9, 0.0 }
  0x98   :  { %87 = vadd.xlane.f32.xlu1 %v86_v11 }
  0x99   :  { %v85_v12 = vmul.f32 %v83_v10, %v83_v10 }
  0x9b   :  { %v89_v13 = vsel %vm72_vm0, %v85_v12, 0.0 }
  0x9c   :  { %90 = vadd.xlane.f32.xlu1 %v89_v13 }
 0x125   :  { %v88_v39 = vpop.xlane.xlu1 %87 }
 0x126   :  { %v92_v40 = vmul.f32 0.015625, %v88_v39 }
 0x128   :  { %v94_v42 = vadd.f32 1e-05, %v92_v40 }
 0x129   :  { %v91_v43 = vpop.xlane.xlu1 %90 }
 0x12a   :  { %5144 = vrsqrt.f32 %v94_v42  ;;  %v93_v44 = vmul.f32 0.015625, %v91_v43 }
 0x12c   :  { %v95_v46 = vadd.f32 1e-05, %v93_v44 }
 0x12e   :  { %5146 = vrsqrt.f32 %v95_v46 }
 0x134   :  { %v5145_v51 = vpop.eup %5144 }
 0x135   :  { %v98_v52 = vmul.f32 %v5145_v51, %v82_v6  ;;  %v44_v6 = vand.u32 127, %v41_v41 }
 0x137   :  { %v104_v54 = vmul.f32 %v103_v50, %v98_v52  ;;  %vm5453_vm3 = vcmp.le.s32.totalorder %v44_v6, %v5393_v45 }
 0x138   :  { %v5147_v55 = vpop.eup %5146 }
 0x139   :  { %v110_v56 = vadd.f32 %v109_v53, %v104_v54  ;;  %v99_v57 = vmul.f32 %v5147_v55, %v83_v10 }
 0x13b   :  { %4375 = vmatmul.mubr.msk.f32.vlgmr.msra.gmra.mrb[0].mxu0 %vm72_vm0, %v110_v56  ;;  %v105_v58 = vmul.f32 %v103_v50, %v99_v57 }
 0x13c   :  { %188 = vmatprep.mubr.f32.mxu0 %v5252_v33 }
 0x13d   :  { %v111_v59 = vadd.f32 %v109_v53, %v105_v58 }
 0x13f   :  { %4376 = vmatmul.mubr.msk.f32.gmra.mrb[2].mxu0 %vm72_vm0, %v111_v59 }
 0x140   :  { %4711 = vmatprep.mubr.msk.f32.mxu0 %vm5253_vm1, %v5252_v33 }
 0x20e   :  { %v5417_v60 = vpop.f32.mrb[0].mxu0 }
 0x20f   :  { %196 = vrot.lane.b32.xlu0 %v5417_v60, %s5254_s15  ;;  %v5421_v61 = vpop.f32.mrb[1].mxu0 }
 0x212   :  { %v5423_v62 = vpop.f32.mrb[2].mxu0 }
 0x213   :  { %274 = vrot.lane.b32.xlu1 %v5423_v62, %s5254_s15  ;;  %v5427_v63 = vpop.f32.mrb[3].mxu0 }
 0x217   :  { %605 = vrot.lane.b32.xlu1 %v5423_v62, %s5255_s16 }
 0x21b   :  { %603 = vrot.lane.b32.xlu1 %v5423_v62, %s5256_s17 }
 0x281   :  { %v197_v2 = vpop.permute.xlu0 %196 }
 0x282   :  { %4710 = vmatpush3.xpose.msk.msra.mxu0 %vm198_vm2, %v197_v2 }
 0x283   :  { %4734 = vmatprep.subr.mxu0 %v5252_v33 }
 0x285   :  { %v275_v3 = vpop.permute.xlu1 %274  ;;  %4712 = vmatmul.mubr.msk.f32.vlgmr.msra.gmra.mrb[4].mxu0 %vm198_vm2, %v5417_v60 }
 0x286   :  { %4715 = vmatpush3.xpose.msk.msra.mxu1 %vm198_vm2, %v275_v3  ;;  %4736 = vmatprep.mubr.msk.f32.mxu0 %vm5253_vm1, %v5252_v33 }
 0x287   :  { %4719 = vmatprep.subr.mxu1 %v5252_v33 }
 0x289   :  { %4717 = vmatmul.mubr.msk.f32.vlgmr.msra.gmra.mrb[0].mxu1 %vm198_vm2, %v5423_v62  ;;  %v606_v4 = vpop.permute.xlu1 %605 }
 0x28a   :  { %4720 = vmatpush3.msra.mxu1 %v5421_v61  ;;  %4735 = vmatpush3.xpose.msk.msra.mxu0 %vm198_vm2, %v606_v4 }
 0x28b   :  { %4721 = vmatprep.mubr.msk.f32.mxu1 %vm5253_vm1, %v5252_v33  ;;  %4724 = vmatprep.subr.mxu1 %v5252_v33 }
 0x28c   :  { %4744 = vmatprep.subr.mxu0 %v5252_v33 }
 0x28d   :  { %v604_v5 = vpop.permute.xlu1 %603 }
 0x28e   :  { %4737 = vmatmul.mubr.msk.f32.vlgmr.msra.gmra.mrb[6].mxu0 %vm198_vm2, %v604_v5 }
 0x28f   :  { %4746 = vmatprep.mubr.msk.f32.mxu0 %vm5253_vm1, %v5252_v33 }
 0x358   :  { %v269_v8 = vpop.f32.mrb[4].mxu0 }
 0x359   :  { %v350_v9 = vmul.f32 0.25, %v269_v8  ;;  %v4713_v10 = vpop.f32.mrb[5].mxu0 }
 0x35b   :  { %v354_v11 = vsel %vm5453_vm3, %v350_v9, -inf }
 0x35c   :  { %v346_v12 = vpop.f32.mrb[0].mxu1  ;;  %v357_v13 = vsel %vm356_vm4, %v354_v11, -inf }
 0x35d   :  { %v351_v14 = vmul.f32 0.25, %v346_v12  ;;  %v4718_v15 = vpop.f32.mrb[1].mxu1  ;;  %358 = vmax.xlane.f32.xlu0 %v357_v13 }
 0x35f   :  { %v355_v16 = vsel %vm5453_vm3, %v351_v14, -inf }
 0x360   :  { %v360_v17 = vsel %vm356_vm4, %v355_v16, -inf }
 0x361   :  { %361 = vmax.xlane.f32.xlu1 %v360_v17  ;;  %v677_v18 = vpop.f32.mrb[6].mxu0 }
 0x362   :  { %v4738_v19 = vpop.f32.mrb[7].mxu0  ;;  %v682_v20 = vmul.f32 0.25, %v677_v18 }
 0x364   :  { %v684_v21 = vsel %vm5453_vm3, %v682_v20, -inf }
 0x365   :  { %v688_v22 = vsel %vm356_vm4, %v684_v21, -inf }
 0x372   :  { %525 = vrot.lane.b32.xlu1 %v5417_v60, %s5256_s17 }
 0x396   :  { %689 = vmax.xlane.f32.xlu1 %v688_v22 }
 0x3a7   :  { %1025 = vrot.lane.b32.xlu1 %v5417_v60, %s5257_s18 }
 0x3ab   :  { %1023 = vrot.lane.b32.xlu1 %v5417_v60, %s5258_s19 }
 0x3af   :  { %1103 = vrot.lane.b32.xlu1 %v5423_v62, %s5257_s18 }
 0x3ea   :  { %v359_v23 = vpop.xlane.xlu0 %358 }
 0x3eb   :  { %v363_v24 = vsub.f32 %v354_v11, %v359_v23 }
 0x3ed   :  { %v365_v25 = vmul.f32 1.442695, %v363_v24 }
 0x3ee   :  { %v362_v26 = vpop.xlane.xlu1 %361 }
 0x3ef   :  { %5148 = vpow2.f32 %v365_v25  ;;  %v364_v27 = vsub.f32 %v355_v16, %v362_v26 }
 0x3f1   :  { %v367_v28 = vmul.f32 1.442695, %v364_v27 }
 0x3f2   :  { %v526_v34 = vpop.permute.xlu1 %525 }
 0x3f3   :  { %5150 = vpow2.f32 %v367_v28 }
 0x3f9   :  { %v5149_v29 = vpop.eup %5148 }
 0x3fa   :  { %v369_v30 = vsel %vm356_vm4, %v5149_v29, 0.0 }
 0x3fb   :  { %370 = vadd.xlane.f32.xlu0 %v369_v30 }
 0x3fd   :  { %v5151_v31 = vpop.eup %5150 }
 0x3fe   :  { %v372_v32 = vsel %vm356_vm4, %v5151_v31, 0.0 }
 0x3ff   :  { %373 = vadd.xlane.f32.xlu0 %v372_v32 }
 0x415   :  { %527 = vrot.lane.b32.xlu0 %v5417_v60, %s5255_s16 }
 0x423   :  { %v690_v35 = vpop.xlane.xlu1 %689 }
 0x424   :  { %v692_v36 = vsub.f32 %v684_v21, %v690_v35 }
 0x426   :  { %v695_v37 = vmul.f32 1.442695, %v692_v36 }
 0x427   :  { %v1026_v53 = vpop.permute.xlu1 %1025 }
 0x428   :  { %5152 = vpow2.f32 %v695_v37 }
 0x42b   :  { %v1024_v55 = vpop.permute.xlu1 %1023 }
 0x42f   :  { %v1104_v57 = vpop.permute.xlu1 %1103 }
 0x432   :  { %v5153_v38 = vpop.eup %5152 }
 0x433   :  { %v700_v39 = vsel %vm356_vm4, %v5153_v38, 0.0 }
 0x434   :  { %701 = vadd.xlane.f32.xlu0 %v700_v39  ;;  %v67_v39 = vld [vmem:[%s6324_s3 + $0x18] sm:$0xff] }
 0x44a   :  { %785 = vrot.lane.b32.xlu0 %v5427_v63, %s5256_s17 }
 0x44e   :  { %1101 = vrot.lane.b32.xlu0 %v5423_v62, %s5258_s19 }
 0x488   :  { %v371_v40 = vpop.xlane.xlu0 %370 }
 0x489   :  { %5154 = vrcp.f32 %v371_v40 }
 0x48c   :  { %v374_v41 = vpop.xlane.xlu0 %373 }
 0x48d   :  { %5156 = vrcp.f32 %v374_v41 }
 0x490   :  { %v528_v50 = vpop.permute.xlu0 %527 }
 0x493   :  { %v5155_v42 = vpop.eup %5154 }
 0x494   :  { %v377_v43 = vmul.f32 %v5155_v42, %v5149_v29 }
 0x496   :  { %4722 = vmatmul.mubr.msk.f32.vlgmr.msra.gmra.mrb[2].mxu1 %vm356_vm4, %v377_v43 }
 0x497   :  { %v5157_v44 = vpop.eup %5156  ;;  %4725 = vmatpush3.msra.mxu1 %v5427_v63  ;;  %4726 = vmatprep.mubr.msk.f32.mxu1 %vm5253_vm1, %v5252_v33 }
 0x498   :  { %v378_v46 = vmul.f32 %v5157_v44, %v5151_v31  ;;  %4729 = vmatprep.subr.mxu1 %v5252_v33 }
 0x49a   :  { %4727 = vmatmul.mubr.msk.f32.vlgmr.msra.gmra.mrb[4].mxu1 %vm356_vm4, %v378_v46 }
 0x49b   :  { %4731 = vmatprep.mubr.msk.f32.mxu1 %vm5253_vm1, %v5252_v33 }
 0x49e   :  { %4730 = vmatpush3.xpose.msk.msra.mxu1 %vm198_vm2, %v528_v50 }
 0x49f   :  { %4739 = vmatprep.subr.mxu1 %v5252_v33 }
 0x4a1   :  { %4732 = vmatmul.mubr.msk.f32.vlgmr.msra.gmra.mrb[6].mxu1 %vm198_vm2, %v526_v34 }
 0x4a2   :  { %4741 = vmatprep.mubr.msk.f32.mxu1 %vm5253_vm1, %v5252_v33 }
 0x4c1   :  { %v702_v51 = vpop.xlane.xlu0 %701 }
 0x4c2   :  { %5158 = vrcp.f32 %v702_v51 }
 0x4c5   :  { %v786_v52 = vpop.permute.xlu0 %785 }
 0x4c6   :  { %4745 = vmatpush3.msra.mxu0 %v786_v52 }
 0x4c7   :  { %4763 = vmatprep.subr.mxu0 %v5252_v33 }
 0x4c9   :  { %v1102_v58 = vpop.permute.xlu0 %1101 }
 0x4cc   :  { %v5159_v54 = vpop.eup %5158 }
 0x4cd   :  { %v706_v56 = vmul.f32 %v5159_v54, %v5153_v38 }
 0x4cf   :  { %4747 = vmatmul.mubr.msk.f32.vlgmr.msra.gmra.mrb[8].mxu0 %vm356_vm4, %v706_v56  ;;  %v64_v56 = vld [vmem:[%s6324_s3] sm:$0xff] }
 0x4d0   :  { %4764 = vmatpush3.xpose.msk.msra.mxu0 %vm198_vm2, %v1026_v53  ;;  %4765 = vmatprep.mubr.msk.f32.mxu0 %vm5253_vm1, %v5252_v33 }
 0x4d1   :  { %4768 = vmatprep.subr.mxu0 %v5252_v33 }
 0x4d3   :  { %4766 = vmatmul.mubr.msk.f32.vlgmr.msra.gmra.mrb[10].mxu0 %vm198_vm2, %v1024_v55 }
 0x4d4   :  { %4769 = vmatpush3.xpose.msk.msra.mxu0 %vm198_vm2, %v1104_v57  ;;  %4770 = vmatprep.mubr.msk.f32.mxu0 %vm5253_vm1, %v5252_v33  ;;  %v65_v57 = vld [vmem:[%s6324_s3 + $0x8] sm:$0xff] }
 0x4d5   :  { %4778 = vmatprep.subr.mxu0 %v5252_v33 }
 0x4d7   :  { %4771 = vmatmul.mubr.msk.f32.vlgmr.msra.gmra.mrb[12].mxu0 %vm198_vm2, %v1102_v58  ;;  %v4964_v58 = vpack.c.bf16 %v65_v57, %v64_v56 }
 0x4d8   :  { %4780 = vmatprep.mubr.msk.f32.mxu0 %vm5253_vm1, %v5252_v33 }
 0x569   :  { %v5510_v59 = vpop.f32.mrb[2].mxu1 }
 0x56a   :  { %v4723_v2 = vpop.f32.mrb[3].mxu1 }
 0x56d   :  { %v5512_v3 = vpop.f32.mrb[4].mxu1 }
 0x56e   :  { %v4728_v4 = vpop.f32.mrb[5].mxu1 }
 0x574   :  { %v599_v5 = vpop.f32.mrb[6].mxu1 }
 0x575   :  { %v681_v6 = vmul.f32 0.25, %v599_v5  ;;  %v4733_v8 = vpop.f32.mrb[7].mxu1 }
 0x577   :  { %v683_v9 = vsel %vm5453_vm3, %v681_v6, -inf }
 0x578   :  { %v685_v10 = vsel %vm356_vm4, %v683_v9, -inf }
 0x579   :  { %686 = vmax.xlane.f32.xlu1 %v685_v10 }
 0x5a2   :  { %v5517_v11 = vpop.f32.mrb[8].mxu0 }
 0x5a3   :  { %v4748_v12 = vpop.f32.mrb[9].mxu0 }
 0x5a6   :  { %v1097_v13 = vpop.f32.mrb[10].mxu0 }
 0x5a7   :  { %v1179_v14 = vmul.f32 0.25, %v1097_v13  ;;  %v4767_v15 = vpop.f32.mrb[11].mxu0 }
 0x5a8   :  { %v69_v15 = vld [vmem:[%s6324_s3 + $0x28] sm:$0xff] }
 0x5a9   :  { %v1181_v16 = vsel %vm5453_vm3, %v1179_v14, -inf }
 0x5aa   :  { %v1175_v17 = vpop.f32.mrb[12].mxu0  ;;  %v1183_v18 = vsel %vm356_vm4, %v1181_v16, -inf }
 0x5ab   :  { %v1180_v19 = vmul.f32 0.25, %v1175_v17  ;;  %1184 = vmax.xlane.f32.xlu1 %v1183_v18  ;;  %v4772_v20 = vpop.f32.mrb[13].mxu0 }
 0x5ad   :  { %v1182_v21 = vsel %vm5453_vm3, %v1180_v19, -inf }
 0x5ae   :  { %v1186_v22 = vsel %vm356_vm4, %v1182_v21, -inf }
 0x5af   :  { %1187 = vmax.xlane.f32.xlu1 %v1186_v22 }
 0x606   :  { %v687_v23 = vpop.xlane.xlu1 %686 }
 0x607   :  { %v691_v24 = vsub.f32 %v683_v9, %v687_v23 }
 0x609   :  { %v693_v25 = vmul.f32 1.442695, %v691_v24 }
 0x60b   :  { %5160 = vpow2.f32 %v693_v25 }
 0x615   :  { %v5161_v26 = vpop.eup %5160 }
 0x616   :  { %v697_v27 = vsel %vm356_vm4, %v5161_v26, 0.0 }
 0x617   :  { %698 = vadd.xlane.f32.xlu0 %v697_v27 }
 0x62d   :  { %708 = vrot.lane.b32.xlu0 %v5421_v61, %s5256_s17 }
 0x631   :  { %1281 = vrot.lane.b32.xlu0 %v5427_v63, %s5258_s19 }
 0x635   :  { %1442 = vrot.lane.b32.xlu0 %v5417_v60, %s5259_s20 }
 0x638   :  { %v1185_v28 = vpop.xlane.xlu1 %1184 }
 0x639   :  { %1520 = vrot.lane.b32.xlu0 %v5423_v62, %s5259_s20  ;;  %v1189_v29 = vsub.f32 %v1181_v16, %v1185_v28 }
 0x63b   :  { %v1191_v30 = vmul.f32 1.442695, %v1189_v29 }
 0x63c   :  { %v1188_v31 = vpop.xlane.xlu1 %1187 }
 0x63d   :  { %5162 = vpow2.f32 %v1191_v30  ;;  %1440 = vrot.lane.b32.xlu0 %v5417_v60, %s5260_s0  ;;  %v1190_v32 = vsub.f32 %v1182_v21, %v1188_v31  ;;  %v66_v60 = vld [vmem:[%s6324_s3 + $0x10] sm:$0xff] }
 0x63e   :  { %v4960_v41 = vpack.c.bf16 %v67_v39, %v66_v60 }
 0x63f   :  { %v1193_v34 = vmul.f32 1.442695, %v1190_v32 }
 0x641   :  { %5164 = vpow2.f32 %v1193_v34 }
 0x647   :  { %v5163_v35 = vpop.eup %5162 }
 0x648   :  { %v1195_v36 = vsel %vm356_vm4, %v5163_v35, 0.0 }
 0x649   :  { %1196 = vadd.xlane.f32.xlu1 %v1195_v36 }
 0x64b   :  { %v5165_v37 = vpop.eup %5164 }
 0x64c   :  { %v1198_v38 = vsel %vm356_vm4, %v5165_v37, 0.0 }
 0x64d   :  { %1199 = vadd.xlane.f32.xlu1 %v1198_v38 }
 0x65e   :  { %1205 = vrot.lane.b32.xlu1 %v5421_v61, %s5258_s19 }
 0x662   :  { %1518 = vrot.lane.b32.xlu1 %v5423_v62, %s5260_s0 }
 0x6a4   :  { %v699_v40 = vpop.xlane.xlu0 %698 }
 0x6a5   :  { %5166 = vrcp.f32 %v699_v40 }
 0x6a8   :  { %v709_v42 = vpop.permute.xlu0 %708 }
 0x6a9   :  { %4740 = vmatpush3.msra.mxu1 %v709_v42  ;;  %v71_v42 = vld [vmem:[%s6324_s3 + $0x38] sm:$0xff] }
 0x6aa   :  { %4961 = vmatprep.subr.bf16.mxu1 %v4960_v41 }
 0x6ac   :  { %v1282_v43 = vpop.permute.xlu0 %1281 }
 0x6ad   :  { %4779 = vmatpush3.msra.mxu0 %v1282_v43 }
 0x6ae   :  { %4790 = vmatprep.subr.mxu0 %v5252_v33 }
 0x6af   :  { %v5167_v44 = vpop.eup %5166 }
 0x6b0   :  { %v705_v62 = vmul.f32 %v5167_v44, %v5161_v26  ;;  %v1443_v51 = vpop.permute.xlu0 %1442 }
 0x6b2   :  { %4742 = vmatmul.mubr.msk.f32.vlgmr.msra.gmra.mrb[8].mxu1 %vm356_vm4, %v705_v62 }
 0x6b3   :  { %4963 = vmatpush3.bf16.msra.mxu1 %v4960_v41 }
 0x6b4   :  { %v1521_v53 = vpop.permute.xlu0 %1520  ;;  %4965 = vmatprep.subr.bf16.mxu1 %v4964_v58 }
 0x6b8   :  { %v1441_v55 = vpop.permute.xlu0 %1440 }
 0x6d6   :  { %v1197_v46 = vpop.xlane.xlu1 %1196 }
 0x6da   :  { %v1200_v50 = vpop.xlane.xlu1 %1199 }
 0x6db   :  { %5168 = vrcp.f32 %v1200_v50 }
 0x6dc   :  { %5170 = vrcp.f32 %v1197_v46 }
 0x6de   :  { %v1206_v6 = vpop.permute.xlu1 %1205 }
 0x6e2   :  { %v1519_v24 = vpop.permute.xlu1 %1518 }
 0x6e5   :  { %v5169_v52 = vpop.eup %5168 }
 0x6e6   :  { %v1204_v54 = vmul.f32 %v5169_v52, %v5165_v37  ;;  %v5171_v5 = vpop.eup %5170 }
 0x6e7   :  { %v1203_v8 = vmul.f32 %v5171_v5, %v5163_v35 }
 0x6e8   :  { %4781 = vmatmul.mubr.msk.f32.vlgmr.msra.gmra.mrb[14].mxu0 %vm356_vm4, %v1204_v54 }
 0x6e9   :  { %4791 = vmatpush3.xpose.msk.msra.mxu0 %vm198_vm2, %v1443_v51  ;;  %4792 = vmatprep.mubr.msk.f32.mxu0 %vm5253_vm1, %v5252_v33  ;;  %v5617_v51 = vld [vmem:[%s6327_s6] sm:$0x3] }
 0x6ea   :  { %4800 = vmatprep.subr.mxu0 %v5252_v33  ;;  %v1862_v52 = vrot.slane %v5617_v51, %v5396_v47 }
 0x6ec   :  { %4793 = vmatmul.mubr.msk.f32.vlgmr.msra.gmra.mrb[16].mxu0 %vm198_vm2, %v1441_v55 }
 0x6ed   :  { %4802 = vmatprep.mubr.msk.f32.mxu0 %vm5253_vm1, %v5252_v33 }
 0x785   :  { %v780_v2 = vpop.f32.mrb[8].mxu1 }
 0x786   :  { %v4743_v4 = vpop.f32.mrb[9].mxu1  ;;  %4753 = vmatprep.mubr.msk.f32.mxu1 %vm198_vm2, %v780_v2 }
 0x787   :  { %4754 = vmatmul.mubr.msk.f32.vlgmr.msra.gmra.mrb[10].mxu1 %vm198_vm2, %v5517_v11 }
 0x788   :  { %4760 = vmatprep.mubr.msk.f32.mxu1 %vm198_vm2, %v5510_v59  ;;  %4967 = vmatpush3.bf16.msra.mxu1 %v4964_v58 }
 0x789   :  { %4773 = vmatprep.subr.mxu1 %v5252_v33 }
 0x78f   :  { %4761 = vmatmul.mubr.msk.f32.vlgmr.msra.gmra.mrb[10].mxu1 %vm198_vm2, %v5512_v3  ;;  %v68_v3 = vld [vmem:[%s6324_s3 + $0x20] sm:$0xff] }
 0x790   :  { %4774 = vmatpush3.msra.mxu1 %v1206_v6  ;;  %4775 = vmatprep.mubr.msk.f32.mxu1 %vm5253_vm1, %v5252_v33  ;;  %v4968_v16 = vpack.c.bf16 %v69_v15, %v68_v3  ;;  %v1903_v15 = vld [vmem:[%s6325_s4] sm:$0xff] }
 0x792   :  { %4969 = vmatprep.subr.bf16.mxu1 %v4968_v16 }
 0x793   :  { %4776 = vmatmul.mubr.msk.f32.vlgmr.msra.gmra.mrb[12].mxu1 %vm356_vm4, %v1203_v8 }
 0x794   :  { %4971 = vmatpush3.bf16.msra.mxu1 %v4968_v16  ;;  %v1905_v16 = vld [vmem:[%s6325_s4 + $0x10] sm:$0xff] }
 0x795   :  { %4795 = vmatprep.subr.mxu1 %v5252_v33 }
 0x7bb   :  { %v1353_v9 = vpop.f32.mrb[14].mxu0 }
 0x7bc   :  { %v4782_v10 = vpop.f32.mrb[15].mxu0 }
 0x7bf   :  { %v1514_v11 = vpop.f32.mrb[16].mxu0 }
 0x7c0   :  { %v1596_v12 = vmul.f32 0.25, %v1514_v11  ;;  %v4794_v59 = vpop.f32.mrb[17].mxu0 }
 0x7c2   :  { %v1598_v13 = vsel %vm5453_vm3, %v1596_v12, -inf }
 0x7c3   :  { %v1600_v14 = vsel %vm356_vm4, %v1598_v13, -inf }
 0x7c4   :  { %1601 = vmax.xlane.f32.xlu0 %v1600_v14  ;;  %v1906_v14 = vld [vmem:[%s6325_s4 + $0x18] sm:$0xff] }
 0x851   :  { %v1602_v17 = vpop.xlane.xlu0 %1601 }
 0x852   :  { %v1606_v18 = vsub.f32 %v1598_v13, %v1602_v17  ;;  %v1904_v13 = vld [vmem:[%s6325_s4 + $0x8] sm:$0xff]  ;;  %v4978_v17 = vpack.c.bf16 %v1905_v16, %v1903_v15  ;;  %v2028_v16 = vld [vmem:[%s6326_s5 + $0x50] sm:$0xff] }
 0x853   :  { %v4976_v3 = vpack.c.bf16 %v1906_v14, %v1904_v13  ;;  %v2044_v13 = vld [vmem:[%s6326_s5 + $0xd0] sm:$0xff]  ;;  %v2045_v14 = vld [vmem:[%s6326_s5 + $0xd8] sm:$0xff] }
 0x854   :  { %v1608_v19 = vmul.f32 1.442695, %v1606_v18  ;;  %v1908_v18 = vld [vmem:[%s6325_s4 + $0x28] sm:$0xff]  ;;  %v5012_v15 = vpack.c.bf16 %v2045_v14, %v2044_v13 }
 0x856   :  { %5172 = vpow2.f32 %v1608_v19  ;;  %v1910_v19 = vld [vmem:[%s6325_s4 + $0x38] sm:$0xff] }
 0x860   :  { %v5173_v20 = vpop.eup %5172 }
 0x861   :  { %v1612_v21 = vsel %vm356_vm4, %v5173_v20, 0.0 }
 0x862   :  { %1613 = vadd.xlane.f32.xlu0 %v1612_v21  ;;  %v1907_v21 = vld [vmem:[%s6325_s4 + $0x20] sm:$0xff] }
 0x866   :  { %v1277_v22 = vpop.f32.mrb[12].mxu1 }
 0x867   :  { %v4777_v23 = vpop.f32.mrb[13].mxu1  ;;  %4787 = vmatprep.mubr.msk.f32.mxu1 %vm198_vm2, %v1277_v22  ;;  %v1909_v22 = vld [vmem:[%s6325_s4 + $0x30] sm:$0xff] }
 0x868   :  { %4788 = vmatmul.mubr.msk.f32.vlgmr.msra.gmra.mrb[10].mxu1 %vm198_vm2, %v1353_v9  ;;  %v4982_v23 = vpack.c.bf16 %v1909_v22, %v1907_v21 }
 0x869   :  { %4796 = vmatpush3.xpose.msk.msra.mxu1 %vm198_vm2, %v1521_v53  ;;  %4797 = vmatprep.mubr.msk.f32.mxu1 %vm5253_vm1, %v5252_v33 }
 0x86a   :  { %4805 = vmatprep.subr.mxu1 %v5252_v33 }
 0x86c   :  { %4798 = vmatmul.mubr.msk.f32.vlgmr.msra.gmra.mrb[14].mxu1 %vm198_vm2, %v1519_v24  ;;  %v1912_v24 = vld [vmem:[%s6325_s4 + $0x48] sm:$0xff] }
 0x86d   :  { %4807 = vmatprep.mubr.msk.f32.mxu1 %vm5253_vm1, %v5252_v33 }
 0x8ef   :  { %v1614_v37 = vpop.xlane.xlu0 %1613 }
 0x93f   :  { %v1592_v25 = vpop.f32.mrb[14].mxu1 }
 0x940   :  { %v1597_v26 = vmul.f32 0.25, %v1592_v25  ;;  %v4799_v27 = vpop.f32.mrb[15].mxu1  ;;  %v1914_v25 = vld [vmem:[%s6325_s4 + $0x58] sm:$0xff] }
 0x941   :  { %v1911_v27 = vld [vmem:[%s6325_s4 + $0x40] sm:$0xff] }
 0x942   :  { %v1599_v28 = vsel %vm5453_vm3, %v1597_v26, -inf  ;;  %v4984_v26 = vpack.c.bf16 %v1914_v25, %v1912_v24 }
 0x943   :  { %v1603_v29 = vsel %vm356_vm4, %v1599_v28, -inf }
 0x944   :  { %1604 = vmax.xlane.f32.xlu1 %v1603_v29 }
 0x955   :  { %1698 = vrot.lane.b32.xlu1 %v5427_v63, %s5260_s0 }
 0x9d1   :  { %v1605_v30 = vpop.xlane.xlu1 %1604 }
 0x9d2   :  { %v1607_v31 = vsub.f32 %v1599_v28, %v1605_v30  ;;  %v1913_v28 = vld [vmem:[%s6325_s4 + $0x50] sm:$0xff]  ;;  %v1916_v30 = vld [vmem:[%s6325_s4 + $0x68] sm:$0xff] }
 0x9d3   :  { %v4986_v29 = vpack.c.bf16 %v1913_v28, %v1911_v27  ;;  %v1893_v28 = vsub.s32 2, %v5393_v45 }
 0x9d4   :  { %v1610_v32 = vmul.f32 1.442695, %v1607_v31  ;;  %v1918_v31 = vld [vmem:[%s6325_s4 + $0x78] sm:$0xff] }
 0x9d5   :  { %v1699_v34 = vpop.permute.xlu1 %1698 }
 0x9d6   :  { %5174 = vpow2.f32 %v1610_v32  ;;  %4806 = vmatpush3.msra.mxu1 %v1699_v34  ;;  %v1915_v32 = vld [vmem:[%s6325_s4 + $0x60] sm:$0xff]  ;;  %v4988_v34 = vpack.c.bf16 %v1918_v31, %v1916_v30  ;;  %v1894_v31 = vrot.slane %v5401_v48, %v1893_v28 }
 0x9d7   :  { %5176 = vrcp.f32 %v1614_v37  ;;  %v2034_v37 = vld [vmem:[%s6326_s5 + $0x80] sm:$0xff] }
 0x9e0   :  { %v5175_v35 = vpop.eup %5174 }
 0x9e1   :  { %v1615_v36 = vsel %vm356_vm4, %v5175_v35, 0.0  ;;  %v5177_v60 = vpop.eup %5176 }
 0x9e2   :  { %1616 = vadd.xlane.f32.xlu0 %v1615_v36  ;;  %v1620_v39 = vmul.f32 %v5177_v60, %v5173_v20  ;;  %v4980_v20 = vpack.c.bf16 %v1910_v19, %v1908_v18  ;;  %v2018_v60 = vld [vmem:[%s6326_s5] sm:$0xff]  ;;  %v2047_v19 = vld [vmem:[%s6326_s5 + $0xe8] sm:$0xff] }
 0x9e3   :  { %v2046_v18 = vld [vmem:[%s6326_s5 + $0xe0] sm:$0xff] }
 0x9e4   :  { %v5016_v21 = vpack.c.bf16 %v2047_v19, %v2046_v18 }
 0x9f8   :  { %1622 = vrot.lane.b32.xlu0 %v5421_v61, %s5260_s0  ;;  %v70_v61 = vld [vmem:[%s6324_s3 + $0x30] sm:$0xff] }
 0x9f9   :  { %v4972_v43 = vpack.c.bf16 %v71_v42, %v70_v61 }
 0x9fb   :  { %4973 = vmatprep.subr.bf16.mxu1 %v4972_v43 }
 0xa6f   :  { %v1617_v38 = vpop.xlane.xlu0 %1616 }
 0xa70   :  { %5178 = vrcp.f32 %v1617_v38  ;;  %v2035_v38 = vld [vmem:[%s6326_s5 + $0x88] sm:$0xff] }
 0xa73   :  { %v1623_v63 = vpop.permute.xlu0 %1622 }
 0xa74   :  { %4801 = vmatpush3.msra.mxu0 %v1623_v63  ;;  %v2019_v63 = vld [vmem:[%s6326_s5 + $0x8] sm:$0xff] }
 0xa75   :  { %4803 = vmatmul.mubr.msk.f32.vlgmr.msra.gmra.mrb[18].mxu0 %vm356_vm4, %v1620_v39  ;;  %4977 = vmatprep.subr.bf16.mxu0 %v4976_v3  ;;  %v4992_v39 = vpack.c.bf16 %v2035_v38, %v2034_v37  ;;  %v4994_v61 = vpack.c.bf16 %v2019_v63, %v2018_v60  ;;  %v2048_v63 = vld [vmem:[%s6326_s5 + $0xf0] sm:$0xff] }
 0xa76   :  { %2001 = vmatprep.mubr.f32.mxu0 %v5252_v33  ;;  %4979 = vmatpush1.bf16.msra.mxu0 %v4978_v17  ;;  %v2029_v17 = vld [vmem:[%s6326_s5 + $0x58] sm:$0xff] }
 0xa77   :  { %4981 = vmatprep.subr.bf16.mxu0 %v4980_v20  ;;  %v5014_v20 = vpack.c.bf16 %v2029_v17, %v2028_v16 }
 0xa7a   :  { %v5179_v40 = vpop.eup %5178  ;;  %4983 = vmatpush1.bf16.msra.mxu0 %v4982_v23 }
 0xa7b   :  { %v1621_v41 = vmul.f32 %v5179_v40, %v5175_v35  ;;  %4985 = vmatprep.subr.bf16.mxu0 %v4984_v26  ;;  %v1917_v35 = vld [vmem:[%s6325_s4 + $0x70] sm:$0xff] }
 0xa7c   :  { %v4990_v36 = vpack.c.bf16 %v1917_v35, %v1915_v32  ;;  %v2036_v40 = vld [vmem:[%s6326_s5 + $0x90] sm:$0xff] }
 0xa7d   :  { %4808 = vmatmul.mubr.msk.f32.vlgmr.msra.gmra.mrb[16].mxu1 %vm356_vm4, %v1621_v41  ;;  %v2037_v41 = vld [vmem:[%s6326_s5 + $0x98] sm:$0xff] }
 0xa7e   :  { %4975 = vmatpush3.bf16.msra.mxu1 %v4972_v43  ;;  %4987 = vmatpush1.bf16.msra.mxu0 %v4986_v29  ;;  %v4996_v42 = vpack.c.bf16 %v2037_v41, %v2036_v40  ;;  %v2020_v43 = vld [vmem:[%s6326_s5 + $0x10] sm:$0xff]  ;;  %v1899_v29 = vsub.s32 3, %v5393_v45  ;;  %v2049_v40 = vld [vmem:[%s6326_s5 + $0xf8] sm:$0xff]  ;;  %v4503_v45 = vld [vmem:[%s6326_s5 + $0x168] sm:$0xff] }
 0xa7f   :  { %4989 = vmatprep.subr.bf16.mxu0 %v4988_v34  ;;  %4993 = vmatprep.subr.bf16.mxu1 %v4992_v39  ;;  %v5020_v41 = vpack.c.bf16 %v2049_v40, %v2048_v63  ;;  %v4424_v63 = vld [vmem:[%s6323_s2 + $0xd8] sm:$0xff] }
 0xa80   :  { %v1900_v35 = vrot.slane %v5401_v48, %v1899_v29  ;;  %v2031_v48 = vld [vmem:[%s6326_s5 + $0x68] sm:$0xff] }
 0xa82   :  { %4991 = vmatpush1.bf16.msra.mxu0 %v4990_v36 }
 0xb48   :  { %v1694_v44 = vpop.f32.mrb[18].mxu0 }
 0xb49   :  { %v4804_v62 = vpop.f32.mrb[19].mxu0  ;;  %4814 = vmatprep.mubr.msk.f32.mxu1 %vm198_vm2, %v1694_v44  ;;  %v2021_v44 = vld [vmem:[%s6326_s5 + $0x18] sm:$0xff] }
 0xb4a   :  { %v2038_v62 = vld [vmem:[%s6326_s5 + $0xa0] sm:$0xff] }
 0xb50   :  { %v1770_v46 = vpop.f32.mrb[16].mxu1 }
 0xb51   :  { %v4809_v50 = vpop.f32.mrb[17].mxu1  ;;  %4815 = vmatmul.mubr.msk.f32.vlgmr.msra.gmra.mrb[10].mxu1 %vm198_vm2, %v1770_v46  ;;  %v2039_v46 = vld [vmem:[%s6326_s5 + $0xa8] sm:$0xff] }
 0xb52   :  { %4995 = vmatpush3.bf16.msra.mxu1 %v4994_v61  ;;  %v4998_v50 = vpack.c.bf16 %v2021_v44, %v2020_v43  ;;  %v2032_v61 = vld [vmem:[%s6326_s5 + $0x70] sm:$0xff]  ;;  %v1919_v44 = vld [vmem:[%s6328_s7] sm:$0x3] }
 0xb53   :  { %4997 = vmatprep.subr.bf16.mxu1 %v4996_v42  ;;  %v2033_v42 = vld [vmem:[%s6326_s5 + $0x78] sm:$0xff] }
 0xb54   :  { %v5022_v43 = vpack.c.bf16 %v2033_v42, %v2032_v61  ;;  %v4423_v61 = vld [vmem:[%s6323_s2 + $0xd0] sm:$0xff] }
 0xb56   :  { %4999 = vmatpush3.bf16.msra.mxu1 %v4998_v50 }
 0xc24   :  { %v4816_v53 = vpop.f32.mrb[10].mxu1 }
 0xc25   :  { %v1858_v54 = vadd.f32 %v4816_v53, %v5332_v1  ;;  %v1846_v55 = vpop.f32.mrb[11].mxu1  ;;  %v2022_v53 = vld [vmem:[%s6326_s5 + $0x20] sm:$0xff] }
 0xc26   :  { %v1857_v56 = vadd.f32 %v1846_v55, %v5327_v0  ;;  %v2040_v55 = vld [vmem:[%s6326_s5 + $0xb0] sm:$0xff] }
 0xc27   :  { %v5623_v57 = vadd.f32 %v1862_v52, %v1858_v54  ;;  %v2023_v54 = vld [vmem:[%s6326_s5 + $0x28] sm:$0xff] }
 0xc28   :  { %v5625_v58 = vadd.f32 %v1862_v52, %v1857_v56  ;;  %v5000_v52 = vpack.c.bf16 %v2039_v46, %v2038_v62  ;;  %v2041_v56 = vld [vmem:[%s6326_s5 + $0xb8] sm:$0xff]  ;;  %v1924_v62 = vrot.slane %v1919_v44, %v5396_v47  ;;  %v1928_v46 = vrot.slane %v1919_v44, %v5404_v49 }
 0xc29   :  { %v1868_v2 = vsel %vm72_vm0, %v5623_v57, 0.0  ;;  %v4428_v44 = vld [vmem:[%s6323_s2 + $0xf8] sm:$0xff] }
 0xc2a   :  { %1869 = vadd.xlane.f32.xlu0 %v1868_v2  ;;  %v1865_v4 = vsel %vm72_vm0, %v5625_v58, 0.0  ;;  %v5002_v2 = vpack.c.bf16 %v2023_v54, %v2022_v53  ;;  %5001 = vmatprep.subr.bf16.mxu1 %v5000_v52 }
 0xc2b   :  { %1866 = vadd.xlane.f32.xlu1 %v1865_v4  ;;  %v5004_v4 = vpack.c.bf16 %v2041_v56, %v2040_v55 }
 0xc2c   :  { %5003 = vmatpush3.bf16.msra.mxu1 %v5002_v2 }
 0xc2d   :  { %5005 = vmatprep.subr.bf16.mxu1 %v5004_v4 }
 0xcb7   :  { %v1870_v5 = vpop.xlane.xlu0 %1869 }
 0xcb8   :  { %v1872_v6 = vmul.f32 0.015625, %v1870_v5  ;;  %v1867_v8 = vpop.xlane.xlu1 %1866  ;;  %v2024_v5 = vld [vmem:[%s6326_s5 + $0x30] sm:$0xff] }
 0xcb9   :  { %v1871_v9 = vmul.f32 0.015625, %v1867_v8  ;;  %v2042_v8 = vld [vmem:[%s6326_s5 + $0xc0] sm:$0xff] }
 0xcba   :  { %v5632_v1 = vsub.f32 %v5623_v57, %v1872_v6  ;;  %v2025_v6 = vld [vmem:[%s6326_s5 + $0x38] sm:$0xff] }
 0xcbb   :  { %v5635_v0 = vsub.f32 %v5625_v58, %v1871_v9  ;;  %v2043_v9 = vld [vmem:[%s6326_s5 + $0xc8] sm:$0xff] }
 0xcbc   :  { %v1876_v10 = vmul.f32 %v5632_v1, %v5632_v1 }
 0xcbd   :  { %v1875_v11 = vmul.f32 %v5635_v0, %v5635_v0 }
 0xcbe   :  { %v1880_v12 = vsel %vm72_vm0, %v1876_v10, 0.0  ;;  %v5006_v10 = vpack.c.bf16 %v2025_v6, %v2024_v5 }
 0xcbf   :  { %1881 = vadd.xlane.f32.xlu1 %v1880_v12  ;;  %v1877_v59 = vsel %vm72_vm0, %v1875_v11, 0.0  ;;  %v5008_v11 = vpack.c.bf16 %v2043_v9, %v2042_v8  ;;  %v2026_v12 = vld [vmem:[%s6326_s5 + $0x40] sm:$0xff] }
 0xcc0   :  { %1878 = vadd.xlane.f32.xlu0 %v1877_v59  ;;  %v2027_v59 = vld [vmem:[%s6326_s5 + $0x48] sm:$0xff]  ;;  %5007 = vmatpush3.bf16.msra.mxu1 %v5006_v10 }
 0xcc1   :  { %v5010_v3 = vpack.c.bf16 %v2027_v59, %v2026_v12  ;;  %5009 = vmatprep.subr.bf16.mxu1 %v5008_v11  ;;  %v2130_v59 = vrot.slane %v5617_v51, %v5404_v49 }
 0xcc4   :  { %5011 = vmatpush3.bf16.msra.mxu1 %v5010_v3 }
 0xcc5   :  { %5013 = vmatprep.subr.bf16.mxu1 %v5012_v15 }
 0xcc8   :  { %5015 = vmatpush3.bf16.msra.mxu1 %v5014_v20 }
 0xcc9   :  { %5017 = vmatprep.subr.bf16.mxu1 %v5016_v21 }
 0xd4c   :  { %v1882_v22 = vpop.xlane.xlu1 %1881 }
 0xd4d   :  { %v1884_v23 = vmul.f32 0.015625, %v1882_v22  ;;  %v1879_v24 = vpop.xlane.xlu0 %1878 }
 0xd4e   :  { %v1883_v25 = vmul.f32 0.015625, %v1879_v24 }
 0xd4f   :  { %v1886_v26 = vadd.f32 1e-05, %v1884_v23 }
 0xd50   :  { %v1885_v27 = vadd.f32 1e-05, %v1883_v25 }
 0xd51   :  { %5180 = vrsqrt.f32 %v1886_v26 }
 0xd52   :  { %5182 = vrsqrt.f32 %v1885_v27 }
 0xd5b   :  { %v5181_v30 = vpop.eup %5180 }
 0xd5c   :  { %v5183_v32 = vpop.eup %5182  ;;  %v1890_v36 = vmul.f32 %v5181_v30, %v5632_v1  ;;  %v4414_v30 = vld [vmem:[%s6323_s2 + $0x88] sm:$0xff] }
 0xd5d   :  { %v1889_v34 = vmul.f32 %v5183_v32, %v5635_v0  ;;  %v2030_v0 = vld [vmem:[%s6326_s5 + $0x60] sm:$0xff] }
 0xd5e   :  { %v1896_v60 = vmul.f32 %v1894_v31, %v1890_v36  ;;  %v5018_v1 = vpack.c.bf16 %v2031_v48, %v2030_v0  ;;  %v4419_v0 = vld [vmem:[%s6323_s2 + $0xb0] sm:$0xff] }
 0xd5f   :  { %v1895_v37 = vmul.f32 %v1894_v31, %v1889_v34  ;;  %v4416_v31 = vld [vmem:[%s6323_s2 + $0x98] sm:$0xff]  ;;  %v4413_v34 = vld [vmem:[%s6323_s2 + $0x80] sm:$0xff] }
 0xd60   :  { %v1902_v39 = vadd.f32 %v1900_v35, %v1896_v60  ;;  %5019 = vmatpush3.bf16.msra.mxu1 %v5018_v1  ;;  %v5024_v32 = vpack.c.bf16 %v4416_v31, %v4414_v30  ;;  %v4422_v1 = vld [vmem:[%s6323_s2 + $0xc8] sm:$0xff] }
 0xd61   :  { %v1901_v38 = vadd.f32 %v1900_v35, %v1895_v37  ;;  %5021 = vmatprep.subr.bf16.mxu1 %v5020_v41  ;;  %v4415_v35 = vld [vmem:[%s6323_s2 + $0x90] sm:$0xff]  ;;  %v4418_v37 = vld [vmem:[%s6323_s2 + $0xa8] sm:$0xff]  ;;  %v5032_v40 = vpack.c.bf16 %v4424_v63, %v4422_v1  ;;  %v4421_v41 = vld [vmem:[%s6323_s2 + $0xc0] sm:$0xff] }
 0xd62   :  { %v5026_v36 = vpack.c.bf16 %v4415_v35, %v4413_v34  ;;  %5025 = vmatprep.subr.bf16.mxu0 %v5024_v32  ;;  %v5034_v42 = vpack.c.bf16 %v4423_v61, %v4421_v41 }
 0xd63   :  { %4409 = vmatmul.mubr.msk.f32.vlgmr.msra.gmra.mrb[20].mxu0 %vm72_vm0, %v1901_v38  ;;  %v4420_v38 = vld [vmem:[%s6323_s2 + $0xb8] sm:$0xff] }
 0xd64   :  { %2007 = vmatprep.mubr.f32.mxu0 %v5252_v33  ;;  %5023 = vmatpush3.bf16.msra.mxu1 %v5022_v43  ;;  %v5028_v60 = vpack.c.bf16 %v4420_v38, %v4418_v37  ;;  %v4426_v43 = vld [vmem:[%s6323_s2 + $0xe8] sm:$0xff] }
 0xd65   :  { %4827 = vmatprep.subr.mxu1 %v5252_v33  ;;  %5027 = vmatpush1.bf16.msra.mxu0 %v5026_v36 }
 0xd66   :  { %5029 = vmatprep.subr.bf16.mxu0 %v5028_v60 }
 0xd67   :  { %4410 = vmatmul.mubr.msk.f32.gmra.mrb[22].mxu0 %vm72_vm0, %v1902_v39  ;;  %v4417_v39 = vld [vmem:[%s6323_s2 + $0xa0] sm:$0xff] }
 0xd68   :  { %2271 = vmatprep.mubr.f32.mxu0 %v5252_v33  ;;  %v5030_v48 = vpack.c.bf16 %v4419_v0, %v4417_v39 }
 0xd6a   :  { %5031 = vmatpush1.bf16.msra.mxu0 %v5030_v48 }
 0xd6b   :  { %5033 = vmatprep.subr.bf16.mxu0 %v5032_v40 }
 0xd6e   :  { %5035 = vmatpush1.bf16.msra.mxu0 %v5034_v42 }
 0xe36   :  { %v2003_v50 = vpop.f32.mrb[20].mxu0 }
 0xe37   :  { %v2004_v52 = vadd.f32 %v2003_v50, %v1924_v62  ;;  %v2005_v53 = vpop.f32.mrb[21].mxu0  ;;  %v4427_v50 = vld [vmem:[%s6323_s2 + $0xf0] sm:$0xff] }
 0xe38   :  { %v2006_v54 = vadd.f32 %v2005_v53, %v1928_v46 }
 0xe39   :  { %v2014_v2 = vmax.f32 %v2004_v52, 0.0 }
 0xe3a   :  { %v2015_v55 = vmax.f32 %v2006_v54, 0.0  ;;  %v2009_v56 = vpop.f32.mrb[22].mxu0 }
 0xe3b   :  { %v2010_v4 = vadd.f32 %v2009_v56, %v1924_v62  ;;  %v2011_v5 = vpop.f32.mrb[23].mxu0  ;;  %v5036_v62 = vpack.c.bf16 %v4428_v44, %v4426_v43 }
 0xe3c   :  { %v2012_v6 = vadd.f32 %v2011_v5, %v1928_v46  ;;  %2114 = vmatprep.mubr.f32.mxu1 %v2015_v55  ;;  %v4425_v46 = vld [vmem:[%s6323_s2 + $0xe0] sm:$0xff] }
 0xe3d   :  { %2115 = vmatmul.mubr.f32.vlgmr.msra.gmra.mrb[18].mxu1 %v2014_v2  ;;  %v2016_v9 = vmax.f32 %v2010_v4, 0.0  ;;  %v5038_v52 = vpack.c.bf16 %v4427_v50, %v4425_v46  ;;  %5037 = vmatprep.subr.bf16.mxu0 %v5036_v62  ;;  %v5877_v5 = vld [vmem:[%s6322_s1 + $0x4] sm:$0xf] }
 0xe3e   :  { %v2017_v8 = vmax.f32 %v2012_v6, 0.0  ;;  %v2192_v6 = vrot.slane %v5877_v5, %v5396_v47 }
 0xe3f   :  { %5039 = vmatpush1.bf16.msra.mxu0 %v5038_v52 }
 0xe40   :  { %2119 = vmatprep.mubr.f32.mxu1 %v2017_v8  ;;  %4817 = vmatprep.subr.mxu0 %v5252_v33 }
 0xe41   :  { %2120 = vmatmul.mubr.f32.gmra.mrb[20].mxu1 %v2016_v9  ;;  %v2198_v9 = vrot.slane %v5877_v5, %v5404_v49 }
 0xe42   :  { %4829 = vmatprep.mubr.msk.f32.mxu1 %vm5253_vm1, %v5252_v33 }
 0xf10   :  { %v4607_v10 = vpop.f32.mrb[18].mxu1 }
 0xf11   :  { %v4608_v11 = vpop.f32.mrb[19].mxu1 }
 0xf12   :  { %v4609_v12 = vadd.f32 %v4608_v11, %v4607_v10 }
 0xf14   :  { %v2125_v13 = vadd.f32 %v4609_v12, %v5625_v58  ;;  %v4610_v14 = vpop.f32.mrb[20].mxu1 }
 0xf15   :  { %v4611_v3 = vpop.f32.mrb[21].mxu1 }
 0xf16   :  { %v5812_v15 = vadd.f32 %v2130_v59, %v2125_v13  ;;  %v4612_v16 = vadd.f32 %v4611_v3, %v4610_v14 }
 0xf18   :  { %v2126_v17 = vadd.f32 %v4612_v16, %v5623_v57  ;;  %v2163_v18 = vsel %vm72_vm0, %v5812_v15, 0.0 }
 0xf19   :  { %2164 = vadd.xlane.f32.xlu0 %v2163_v18 }
 0xf1a   :  { %v5817_v19 = vadd.f32 %v2130_v59, %v2126_v17 }
 0xf1c   :  { %v2166_v20 = vsel %vm72_vm0, %v5817_v19, 0.0 }
 0xf1d   :  { %2167 = vadd.xlane.f32.xlu1 %v2166_v20 }
 0xfa6   :  { %v2165_v51 = vpop.xlane.xlu0 %2164 }
 0xfa7   :  { %v2169_v21 = vmul.f32 0.015625, %v2165_v51 }
 0xfa9   :  { %v2171_v58 = vsub.f32 %v5812_v15, %v2169_v21 }
 0xfaa   :  { %v2168_v22 = vpop.xlane.xlu1 %2167 }
 0xfab   :  { %v2170_v23 = vmul.f32 0.015625, %v2168_v22  ;;  %v2173_v24 = vmul.f32 %v2171_v58, %v2171_v58 }
 0xfad   :  { %v2172_v25 = vsub.f32 %v5817_v19, %v2170_v23  ;;  %v2175_v57 = vsel %vm72_vm0, %v2173_v24, 0.0 }
 0xfae   :  { %2176 = vadd.xlane.f32.xlu0 %v2175_v57 }
 0xfaf   :  { %v2174_v26 = vmul.f32 %v2172_v25, %v2172_v25 }
 0xfb1   :  { %v2178_v27 = vsel %vm72_vm0, %v2174_v26, 0.0 }
 0xfb2   :  { %2179 = vadd.xlane.f32.xlu1 %v2178_v27 }
0x103b   :  { %v2177_v53 = vpop.xlane.xlu0 %2176 }
0x103c   :  { %v2181_v54 = vmul.f32 0.015625, %v2177_v53 }
0x103e   :  { %v2183_v55 = vadd.f32 1e-05, %v2181_v54 }
0x103f   :  { %v2180_v56 = vpop.xlane.xlu1 %2179 }
0x1040   :  { %5184 = vrsqrt.f32 %v2183_v55  ;;  %v2182_v2 = vmul.f32 0.015625, %v2180_v56 }
0x1042   :  { %v2184_v4 = vadd.f32 1e-05, %v2182_v2 }
0x1044   :  { %5186 = vrsqrt.f32 %v2184_v4 }
0x104a   :  { %v5185_v8 = vpop.eup %5184 }
0x104b   :  { %v2187_v10 = vmul.f32 %v5185_v8, %v2171_v58 }
0x104d   :  { %v2193_v11 = vmul.f32 %v2192_v6, %v2187_v10 }
0x104e   :  { %v5187_v12 = vpop.eup %5186 }
0x104f   :  { %v2199_v59 = vadd.f32 %v2198_v9, %v2193_v11  ;;  %v2188_v13 = vmul.f32 %v5187_v12, %v2172_v25 }
0x1051   :  { %4437 = vmatmul.mubr.msk.f32.vlgmr.msra.gmra.mrb[24].mxu0 %vm72_vm0, %v2199_v59  ;;  %v2194_v14 = vmul.f32 %v2192_v6, %v2188_v13 }
0x1052   :  { %2277 = vmatprep.mubr.f32.mxu0 %v5252_v33 }
0x1053   :  { %v2200_v3 = vadd.f32 %v2198_v9, %v2194_v14 }
0x1055   :  { %4438 = vmatmul.mubr.msk.f32.gmra.mrb[26].mxu0 %vm72_vm0, %v2200_v3 }
0x1056   :  { %4819 = vmatprep.mubr.msk.f32.mxu0 %vm5253_vm1, %v5252_v33 }
0x1124   :  { %v5888_v16 = vpop.f32.mrb[24].mxu0 }
0x1125   :  { %2285 = vrot.lane.b32.xlu0 %v5888_v16, %s5254_s15  ;;  %v5892_v17 = vpop.f32.mrb[25].mxu0 }
0x1126   :  { %4828 = vmatpush3.msra.mxu1 %v5892_v17 }
0x1127   :  { %4837 = vmatprep.subr.mxu1 %v5252_v33 }
0x1128   :  { %v5896_v18 = vpop.f32.mrb[26].mxu0 }
0x1129   :  { %2362 = vrot.lane.b32.xlu1 %v5896_v18, %s5254_s15  ;;  %v5900_v20 = vpop.f32.mrb[27].mxu0 }
0x1197   :  { %v2286_v51 = vpop.permute.xlu0 %2285 }
0x1198   :  { %4818 = vmatpush3.xpose.msk.msra.mxu0 %vm198_vm2, %v2286_v51 }
0x1199   :  { %4822 = vmatprep.subr.mxu0 %v5252_v33 }
0x119b   :  { %4820 = vmatmul.mubr.msk.f32.vlgmr.msra.gmra.mrb[28].mxu0 %vm198_vm2, %v5888_v16  ;;  %v2363_v21 = vpop.permute.xlu1 %2362 }
0x119c   :  { %4823 = vmatpush3.xpose.msk.msra.mxu0 %vm198_vm2, %v2363_v21  ;;  %4824 = vmatprep.mubr.msk.f32.mxu0 %vm5253_vm1, %v5252_v33 }
0x119d   :  { %4832 = vmatprep.subr.mxu0 %v5252_v33 }
0x119f   :  { %4825 = vmatmul.mubr.msk.f32.vlgmr.msra.gmra.mrb[30].mxu0 %vm198_vm2, %v5896_v18 }
0x11a0   :  { %4833 = vmatpush3.msra.mxu0 %v5900_v20  ;;  %4834 = vmatprep.mubr.msk.f32.mxu0 %vm5253_vm1, %v5252_v33 }
0x11a1   :  { %4842 = vmatprep.subr.mxu0 %v5252_v33 }
0x126e   :  { %v2357_v58 = vpop.f32.mrb[28].mxu0 }
0x126f   :  { %v4821_v22 = vpop.f32.mrb[29].mxu0  ;;  %v2438_v27 = vmul.f32 0.25, %v2357_v58 }
0x1271   :  { %v2440_v30 = vsel %vm5453_vm3, %v2438_v27, -inf }
0x1272   :  { %v2434_v23 = vpop.f32.mrb[30].mxu0  ;;  %v2442_v31 = vsel %vm356_vm4, %v2440_v30, -inf }
0x1273   :  { %v2439_v24 = vmul.f32 0.25, %v2434_v23  ;;  %v4826_v25 = vpop.f32.mrb[31].mxu0 }
0x1275   :  { %v2441_v57 = vsel %vm5453_vm3, %v2439_v24, -inf }
0x1276   :  { %v2445_v26 = vsel %vm356_vm4, %v2441_v57, -inf }
0x1277   :  { %2446 = vmax.xlane.f32.xlu1 %v2445_v26 }
0x1288   :  { %2688 = vrot.lane.b32.xlu1 %v5896_v18, %s5256_s17 }
0x12ac   :  { %2443 = vmax.xlane.f32.xlu1 %v2442_v31 }
0x12bd   :  { %2610 = vrot.lane.b32.xlu1 %v5888_v16, %s5256_s17 }
0x1304   :  { %v2447_v32 = vpop.xlane.xlu1 %2446 }
0x1305   :  { %v2449_v34 = vsub.f32 %v2441_v57, %v2447_v32 }
0x1307   :  { %v2452_v35 = vmul.f32 1.442695, %v2449_v34 }
0x1308   :  { %v2689_v38 = vpop.permute.xlu1 %2688 }
0x1309   :  { %5188 = vpow2.f32 %v2452_v35 }
0x1313   :  { %v5189_v36 = vpop.eup %5188 }
0x1314   :  { %v2457_v37 = vsel %vm356_vm4, %v5189_v36, 0.0 }
0x1315   :  { %2458 = vadd.xlane.f32.xlu0 %v2457_v37 }
0x132b   :  { %2690 = vrot.lane.b32.xlu0 %v5896_v18, %s5255_s16 }
0x1339   :  { %v2444_v60 = vpop.xlane.xlu1 %2443 }
0x133a   :  { %v2448_v39 = vsub.f32 %v2440_v30, %v2444_v60  ;;  %v4431_v60 = vld [vmem:[%s6324_s3 + $0x50] sm:$0xff] }
0x133c   :  { %v2450_v0 = vmul.f32 1.442695, %v2448_v39  ;;  %v4432_v39 = vld [vmem:[%s6324_s3 + $0x58] sm:$0xff] }
0x133d   :  { %v2611_v46 = vpop.permute.xlu1 %2610 }
0x133e   :  { %5190 = vpow2.f32 %v2450_v0  ;;  %v5040_v0 = vpack.c.bf16 %v4432_v39, %v4431_v60 }
0x1348   :  { %v5191_v48 = vpop.eup %5190 }
0x1349   :  { %v2454_v1 = vsel %vm356_vm4, %v5191_v48, 0.0 }
0x134a   :  { %2455 = vadd.xlane.f32.xlu0 %v2454_v1  ;;  %v4430_v1 = vld [vmem:[%s6324_s3 + $0x48] sm:$0xff] }
0x1360   :  { %2612 = vrot.lane.b32.xlu0 %v5888_v16, %s5255_s16 }
0x13a2   :  { %v2459_v63 = vpop.xlane.xlu0 %2458 }
0x13a3   :  { %5192 = vrcp.f32 %v2459_v63 }
0x13a6   :  { %v2691_v61 = vpop.permute.xlu0 %2690 }
0x13ad   :  { %v5193_v40 = vpop.eup %5192 }
0x13ae   :  { %v2463_v41 = vmul.f32 %v5193_v40, %v5189_v36 }
0x13b0   :  { %4835 = vmatmul.mubr.msk.f32.vlgmr.msra.gmra.mrb[32].mxu0 %vm356_vm4, %v2463_v41 }
0x13b1   :  { %4843 = vmatpush3.xpose.msk.msra.mxu0 %vm198_vm2, %v2691_v61  ;;  %4844 = vmatprep.mubr.msk.f32.mxu0 %vm5253_vm1, %v5252_v33 }
0x13b2   :  { %4852 = vmatprep.subr.mxu0 %v5252_v33 }
0x13b4   :  { %4845 = vmatmul.mubr.msk.f32.vlgmr.msra.gmra.mrb[34].mxu0 %vm198_vm2, %v2689_v38 }
0x13b5   :  { %4854 = vmatprep.mubr.msk.f32.mxu0 %vm5253_vm1, %v5252_v33 }
0x13d7   :  { %v2456_v42 = vpop.xlane.xlu0 %2455 }
0x13d8   :  { %5194 = vrcp.f32 %v2456_v42 }
0x13db   :  { %v2613_v62 = vpop.permute.xlu0 %2612 }
0x13e2   :  { %v5195_v43 = vpop.eup %5194 }
0x13e3   :  { %v2462_v44 = vmul.f32 %v5195_v43, %v5191_v48  ;;  %v4429_v48 = vld [vmem:[%s6324_s3 + $0x40] sm:$0xff] }
0x13e4   :  { %v5044_v63 = vpack.c.bf16 %v4430_v1, %v4429_v48 }
0x13e5   :  { %4830 = vmatmul.mubr.msk.f32.vlgmr.msra.gmra.mrb[22].mxu1 %vm356_vm4, %v2462_v44 }
0x13e6   :  { %4838 = vmatpush3.xpose.msk.msra.mxu1 %vm198_vm2, %v2613_v62  ;;  %4839 = vmatprep.mubr.msk.f32.mxu1 %vm5253_vm1, %v5252_v33 }
0x13e7   :  { %4847 = vmatprep.subr.mxu1 %v5252_v33 }
0x13e9   :  { %4840 = vmatmul.mubr.msk.f32.vlgmr.msra.gmra.mrb[24].mxu1 %vm198_vm2, %v2611_v46 }
0x13ea   :  { %4849 = vmatprep.mubr.msk.f32.mxu1 %vm5253_vm1, %v5252_v33 }
0x1483   :  { %v5948_v50 = vpop.f32.mrb[32].mxu0 }
0x1484   :  { %v4836_v52 = vpop.f32.mrb[33].mxu0 }
0x1487   :  { %v2762_v53 = vpop.f32.mrb[34].mxu0 }
0x1488   :  { %v2767_v54 = vmul.f32 0.25, %v2762_v53  ;;  %v4846_v55 = vpop.f32.mrb[35].mxu0 }
0x148a   :  { %v2769_v56 = vsel %vm5453_vm3, %v2767_v54, -inf }
0x148b   :  { %v2773_v2 = vsel %vm356_vm4, %v2769_v56, -inf }
0x148c   :  { %2774 = vmax.xlane.f32.xlu1 %v2773_v2 }
0x149d   :  { %3110 = vrot.lane.b32.xlu1 %v5888_v16, %s5257_s18 }
0x14a1   :  { %3108 = vrot.lane.b32.xlu1 %v5888_v16, %s5258_s19 }
0x14a5   :  { %3188 = vrot.lane.b32.xlu1 %v5896_v18, %s5257_s18 }
0x14b8   :  { %v5959_v4 = vpop.f32.mrb[22].mxu1 }
0x14b9   :  { %v4831_v6 = vpop.f32.mrb[23].mxu1 }
0x14bc   :  { %v2684_v8 = vpop.f32.mrb[24].mxu1 }
0x14bd   :  { %v4841_v9 = vpop.f32.mrb[25].mxu1  ;;  %v2766_v10 = vmul.f32 0.25, %v2684_v8 }
0x14bf   :  { %v2768_v11 = vsel %vm5453_vm3, %v2766_v10, -inf }
0x14c0   :  { %v2770_v12 = vsel %vm356_vm4, %v2768_v11, -inf }
0x14c9   :  { %2771 = vmax.xlane.f32.xlu1 %v2770_v12 }
0x1519   :  { %v2775_v59 = vpop.xlane.xlu1 %2774 }
0x151a   :  { %v2777_v13 = vsub.f32 %v2769_v56, %v2775_v59 }
0x151c   :  { %v2780_v14 = vmul.f32 1.442695, %v2777_v13 }
0x151d   :  { %v3111_v21 = vpop.permute.xlu1 %3110 }
0x151e   :  { %5196 = vpow2.f32 %v2780_v14 }
0x1521   :  { %v3109_v58 = vpop.permute.xlu1 %3108 }
0x1525   :  { %v3189_v22 = vpop.permute.xlu1 %3188 }
0x1528   :  { %v5197_v3 = vpop.eup %5196 }
0x1529   :  { %v2785_v51 = vsel %vm356_vm4, %v5197_v3, 0.0 }
0x152a   :  { %2786 = vadd.xlane.f32.xlu0 %v2785_v51  ;;  %v4434_v51 = vld [vmem:[%s6324_s3 + $0x68] sm:$0xff] }
0x1540   :  { %2870 = vrot.lane.b32.xlu0 %v5900_v20, %s5256_s17 }
0x1544   :  { %3186 = vrot.lane.b32.xlu0 %v5896_v18, %s5258_s19 }
0x1556   :  { %v2772_v23 = vpop.xlane.xlu1 %2771 }
0x1557   :  { %v2776_v24 = vsub.f32 %v2768_v11, %v2772_v23 }
0x1559   :  { %v2778_v25 = vmul.f32 1.442695, %v2776_v24 }
0x155b   :  { %5198 = vpow2.f32 %v2778_v25 }
0x1565   :  { %v5199_v57 = vpop.eup %5198 }
0x1566   :  { %v2782_v26 = vsel %vm356_vm4, %v5199_v57, 0.0 }
0x1567   :  { %2783 = vadd.xlane.f32.xlu0 %v2782_v26 }
0x157d   :  { %2793 = vrot.lane.b32.xlu0 %v5892_v17, %s5256_s17 }
0x1581   :  { %3366 = vrot.lane.b32.xlu0 %v5900_v20, %s5258_s19 }
0x1585   :  { %3527 = vrot.lane.b32.xlu0 %v5888_v16, %s5259_s20 }
0x1589   :  { %3605 = vrot.lane.b32.xlu0 %v5896_v18, %s5259_s20 }
0x158d   :  { %3525 = vrot.lane.b32.xlu0 %v5888_v16, %s5260_s0 }
0x15b7   :  { %v2787_v27 = vpop.xlane.xlu0 %2786 }
0x15b8   :  { %5200 = vrcp.f32 %v2787_v27 }
0x15bb   :  { %v2871_v30 = vpop.permute.xlu0 %2870 }
0x15bc   :  { %4853 = vmatpush3.msra.mxu0 %v2871_v30 }
0x15bd   :  { %4871 = vmatprep.subr.mxu0 %v5252_v33 }
0x15bf   :  { %v3187_v16 = vpop.permute.xlu0 %3186 }
0x15c2   :  { %v5201_v31 = vpop.eup %5200 }
0x15c3   :  { %v2791_v32 = vmul.f32 %v5201_v31, %v5197_v3  ;;  %v4433_v3 = vld [vmem:[%s6324_s3 + $0x60] sm:$0xff] }
0x15c5   :  { %4855 = vmatmul.mubr.msk.f32.vlgmr.msra.gmra.mrb[36].mxu0 %vm356_vm4, %v2791_v32 }
0x15c6   :  { %4872 = vmatpush3.xpose.msk.msra.mxu0 %vm198_vm2, %v3111_v21  ;;  %4873 = vmatprep.mubr.msk.f32.mxu0 %vm5253_vm1, %v5252_v33 }
0x15c7   :  { %4876 = vmatprep.subr.mxu0 %v5252_v33 }
0x15c9   :  { %4874 = vmatmul.mubr.msk.f32.vlgmr.msra.gmra.mrb[38].mxu0 %vm198_vm2, %v3109_v58  ;;  %v5048_v58 = vpack.c.bf16 %v4434_v51, %v4433_v3 }
0x15ca   :  { %4877 = vmatpush3.xpose.msk.msra.mxu0 %vm198_vm2, %v3189_v22  ;;  %4878 = vmatprep.mubr.msk.f32.mxu0 %vm5253_vm1, %v5252_v33 }
0x15cb   :  { %4886 = vmatprep.subr.mxu0 %v5252_v33 }
0x15cd   :  { %4879 = vmatmul.mubr.msk.f32.vlgmr.msra.gmra.mrb[40].mxu0 %vm198_vm2, %v3187_v16 }
0x15ce   :  { %4888 = vmatprep.mubr.msk.f32.mxu0 %vm5253_vm1, %v5252_v33 }
0x15f4   :  { %v2784_v34 = vpop.xlane.xlu0 %2783 }
0x15f5   :  { %5202 = vrcp.f32 %v2784_v34 }
0x15f8   :  { %v2794_v35 = vpop.permute.xlu0 %2793 }
0x15f9   :  { %4848 = vmatpush3.msra.mxu1 %v2794_v35 }
0x15fa   :  { %5041 = vmatprep.subr.bf16.mxu1 %v5040_v0 }
0x15fc   :  { %v3367_v36 = vpop.permute.xlu0 %3366 }
0x15fd   :  { %4887 = vmatpush3.msra.mxu0 %v3367_v36 }
0x15fe   :  { %4898 = vmatprep.subr.mxu0 %v5252_v33 }
0x15ff   :  { %v5203_v37 = vpop.eup %5202 }
0x1600   :  { %v2790_v38 = vmul.f32 %v5203_v37, %v5199_v57  ;;  %v3528_v23 = vpop.permute.xlu0 %3527 }
0x1602   :  { %4850 = vmatmul.mubr.msk.f32.vlgmr.msra.gmra.mrb[26].mxu1 %vm356_vm4, %v2790_v38 }
0x1603   :  { %5043 = vmatpush3.bf16.msra.mxu1 %v5040_v0 }
0x1604   :  { %5045 = vmatprep.subr.bf16.mxu1 %v5044_v63  ;;  %v3606_v57 = vpop.permute.xlu0 %3605 }
0x1608   :  { %v3526_v27 = vpop.permute.xlu0 %3525 }
0x1698   :  { %v2942_v40 = vpop.f32.mrb[36].mxu0 }
0x1699   :  { %v4856_v41 = vpop.f32.mrb[37].mxu0 }
0x169c   :  { %v3182_v61 = vpop.f32.mrb[38].mxu0 }
0x169d   :  { %v3264_v42 = vmul.f32 0.25, %v3182_v61  ;;  %v4875_v43 = vpop.f32.mrb[39].mxu0 }
0x169f   :  { %v3266_v44 = vsel %vm5453_vm3, %v3264_v42, -inf }
0x16a0   :  { %v3260_v62 = vpop.f32.mrb[40].mxu0  ;;  %v3268_v46 = vsel %vm356_vm4, %v3266_v44, -inf }
0x16a1   :  { %v3265_v52 = vmul.f32 0.25, %v3260_v62  ;;  %3269 = vmax.xlane.f32.xlu1 %v3268_v46  ;;  %v4880_v53 = vpop.f32.mrb[41].mxu0 }
0x16a3   :  { %v3267_v54 = vsel %vm5453_vm3, %v3265_v52, -inf }
0x16a4   :  { %v3271_v55 = vsel %vm356_vm4, %v3267_v54, -inf }
0x16a5   :  { %3272 = vmax.xlane.f32.xlu1 %v3271_v55 }
0x16d5   :  { %v2865_v56 = vpop.f32.mrb[26].mxu1 }
0x16d6   :  { %v4851_v2 = vpop.f32.mrb[27].mxu1  ;;  %4861 = vmatprep.mubr.msk.f32.mxu1 %vm198_vm2, %v2865_v56 }
0x16d7   :  { %4862 = vmatmul.mubr.msk.f32.vlgmr.msra.gmra.mrb[28].mxu1 %vm198_vm2, %v2942_v40 }
0x16d8   :  { %4868 = vmatprep.mubr.msk.f32.mxu1 %vm198_vm2, %v5959_v4  ;;  %5047 = vmatpush3.bf16.msra.mxu1 %v5044_v63 }
0x16d9   :  { %4881 = vmatprep.subr.mxu1 %v5252_v33 }
0x16df   :  { %4869 = vmatmul.mubr.msk.f32.vlgmr.msra.gmra.mrb[28].mxu1 %vm198_vm2, %v5948_v50 }
0x16e0   :  { %4883 = vmatprep.mubr.msk.f32.mxu1 %vm5253_vm1, %v5252_v33 }
0x172e   :  { %v3270_v6 = vpop.xlane.xlu1 %3269 }
0x172f   :  { %v3274_v8 = vsub.f32 %v3266_v44, %v3270_v6 }
0x1731   :  { %v3276_v9 = vmul.f32 1.442695, %v3274_v8 }
0x1732   :  { %v3273_v10 = vpop.xlane.xlu1 %3272 }
0x1733   :  { %5204 = vpow2.f32 %v3276_v9  ;;  %v3275_v11 = vsub.f32 %v3267_v54, %v3273_v10  ;;  %v4436_v9 = vld [vmem:[%s6324_s3 + $0x78] sm:$0xff] }
0x1735   :  { %v3278_v12 = vmul.f32 1.442695, %v3275_v11 }
0x1737   :  { %5206 = vpow2.f32 %v3278_v12 }
0x173d   :  { %v5205_v59 = vpop.eup %5204 }
0x173e   :  { %v3280_v4 = vsel %vm356_vm4, %v5205_v59, 0.0 }
0x173f   :  { %3281 = vadd.xlane.f32.xlu1 %v3280_v4 }
0x1741   :  { %v5207_v13 = vpop.eup %5206 }
0x1742   :  { %v3283_v14 = vsel %vm356_vm4, %v5207_v13, 0.0 }
0x1743   :  { %3284 = vadd.xlane.f32.xlu1 %v3283_v14 }
0x1754   :  { %3290 = vrot.lane.b32.xlu1 %v5892_v17, %s5258_s19  ;;  %s4364_s19 = sshll.u32 %s5261_s13, 4  ;;  %s4365_s19 = int_to_ptr.vmem [resolvable:$true] %s4364_s19 }
0x1755   :  { %p5233_p1 = scmp.lt.s32.totalorder %s4365_s19, %s4365_s19 }
0x1758   :  { %3603 = vrot.lane.b32.xlu1 %v5896_v18, %s5260_s0 }
0x17cc   :  { %v3282_v50 = vpop.xlane.xlu1 %3281 }
0x17cd   :  { %5208 = vrcp.f32 %v3282_v50 }
0x17d0   :  { %v3285_v21 = vpop.xlane.xlu1 %3284 }
0x17d1   :  { %5210 = vrcp.f32 %v3285_v21 }
0x17d4   :  { %v3291_v22 = vpop.permute.xlu1 %3290 }
0x17d5   :  { %4882 = vmatpush3.msra.mxu1 %v3291_v22 }
0x17d6   :  { %5049 = vmatprep.subr.bf16.mxu1 %v5048_v58 }
0x17d7   :  { %v5209_v24 = vpop.eup %5208 }
0x17d8   :  { %v3288_v25 = vmul.f32 %v5209_v24, %v5205_v59  ;;  %v3604_v34 = vpop.permute.xlu1 %3603 }
0x17da   :  { %4884 = vmatmul.mubr.msk.f32.vlgmr.msra.gmra.mrb[30].mxu1 %vm356_vm4, %v3288_v25 }
0x17db   :  { %v5211_v18 = vpop.eup %5210  ;;  %5051 = vmatpush3.bf16.msra.mxu1 %v5048_v58 }
0x17dc   :  { %v3289_v26 = vmul.f32 %v5211_v18, %v5207_v13  ;;  %4903 = vmatprep.subr.mxu1 %v5252_v33  ;;  %v6080_v13 = vld [vmem:[%s6327_s6 + $0x2] sm:$0x3] }
0x17dd   :  { %v3947_v14 = vrot.slane %v6080_v13, %v5396_v47 }
0x17de   :  { %4889 = vmatmul.mubr.msk.f32.vlgmr.msra.gmra.mrb[42].mxu0 %vm356_vm4, %v3289_v26 }
0x17df   :  { %4899 = vmatpush3.xpose.msk.msra.mxu0 %vm198_vm2, %v3528_v23  ;;  %4900 = vmatprep.mubr.msk.f32.mxu0 %vm5253_vm1, %v5252_v33 }
0x17e0   :  { %4908 = vmatprep.subr.mxu0 %v5252_v33 }
0x17e2   :  { %4901 = vmatmul.mubr.msk.f32.vlgmr.msra.gmra.mrb[44].mxu0 %vm198_vm2, %v3526_v27 }
0x17e3   :  { %4910 = vmatprep.mubr.msk.f32.mxu0 %vm5253_vm1, %v5252_v33 }
0x18ad   :  { %v3362_v30 = vpop.f32.mrb[30].mxu1 }
0x18ae   :  { %v4885_v31 = vpop.f32.mrb[31].mxu1  ;;  %4895 = vmatprep.mubr.msk.f32.mxu1 %vm198_vm2, %v3362_v30 }
0x18b1   :  { %v3438_v32 = vpop.f32.mrb[42].mxu0 }
0x18b2   :  { %v4890_v16 = vpop.f32.mrb[43].mxu0  ;;  %4896 = vmatmul.mubr.msk.f32.vlgmr.msra.gmra.mrb[28].mxu1 %vm198_vm2, %v3438_v32 }
0x18b3   :  { %4904 = vmatpush3.xpose.msk.msra.mxu1 %vm198_vm2, %v3606_v57  ;;  %4905 = vmatprep.mubr.msk.f32.mxu1 %vm5253_vm1, %v5252_v33  ;;  %v4472_v16 = vld [vmem:[%s6325_s4 + $0x88] sm:$0xff] }
0x18b4   :  { %4913 = vmatprep.subr.mxu1 %v5252_v33 }
0x18b5   :  { %v3599_v35 = vpop.f32.mrb[44].mxu0 }
0x18b6   :  { %v3681_v36 = vmul.f32 0.25, %v3599_v35  ;;  %v4902_v37 = vpop.f32.mrb[45].mxu0  ;;  %4906 = vmatmul.mubr.msk.f32.vlgmr.msra.gmra.mrb[32].mxu1 %vm198_vm2, %v3604_v34  ;;  %v4474_v34 = vld [vmem:[%s6325_s4 + $0x98] sm:$0xff] }
0x18b7   :  { %4915 = vmatprep.mubr.msk.f32.mxu1 %vm5253_vm1, %v5252_v33  ;;  %v5056_v35 = vpack.c.bf16 %v4474_v34, %v4472_v16  ;;  %v4473_v37 = vld [vmem:[%s6325_s4 + $0x90] sm:$0xff]  ;;  %v4499_v16 = vld [vmem:[%s6326_s5 + $0x148] sm:$0xff] }
0x18b8   :  { %v3683_v38 = vsel %vm5453_vm3, %v3681_v36, -inf  ;;  %v4471_v36 = vld [vmem:[%s6325_s4 + $0x80] sm:$0xff]  ;;  %v4516_v34 = vld [vmem:[%s6326_s5 + $0x1d0] sm:$0xff] }
0x18b9   :  { %v3685_v60 = vsel %vm356_vm4, %v3683_v38, -inf }
0x18ba   :  { %3686 = vmax.xlane.f32.xlu0 %v3685_v60  ;;  %v4476_v60 = vld [vmem:[%s6325_s4 + $0xa8] sm:$0xff] }
0x1947   :  { %v3687_v39 = vpop.xlane.xlu0 %3686 }
0x1948   :  { %v3691_v0 = vsub.f32 %v3683_v38, %v3687_v39  ;;  %v5058_v38 = vpack.c.bf16 %v4473_v37, %v4471_v36  ;;  %v4478_v39 = vld [vmem:[%s6325_s4 + $0xb8] sm:$0xff] }
0x194a   :  { %v3693_v48 = vmul.f32 1.442695, %v3691_v0  ;;  %v5060_v0 = vpack.c.bf16 %v4478_v39, %v4476_v60  ;;  %v4501_v60 = vld [vmem:[%s6326_s5 + $0x158] sm:$0xff]  ;;  %v4518_v39 = vld [vmem:[%s6326_s5 + $0x1e0] sm:$0xff] }
0x194c   :  { %5212 = vpow2.f32 %v3693_v48  ;;  %v4475_v48 = vld [vmem:[%s6325_s4 + $0xa0] sm:$0xff] }
0x1956   :  { %v5213_v1 = vpop.eup %5212 }
0x1957   :  { %v3697_v63 = vsel %vm356_vm4, %v5213_v1, 0.0 }
0x1958   :  { %3698 = vadd.xlane.f32.xlu0 %v3697_v63 }
0x1989   :  { %v3677_v40 = vpop.f32.mrb[32].mxu1 }
0x198a   :  { %v3682_v41 = vmul.f32 0.25, %v3677_v40  ;;  %v4907_v61 = vpop.f32.mrb[33].mxu1  ;;  %v4480_v40 = vld [vmem:[%s6325_s4 + $0xc8] sm:$0xff] }
0x198c   :  { %v3684_v42 = vsel %vm5453_vm3, %v3682_v41, -inf  ;;  %v4482_v41 = vld [vmem:[%s6325_s4 + $0xd8] sm:$0xff] }
0x198d   :  { %v3688_v43 = vsel %vm356_vm4, %v3684_v42, -inf  ;;  %v5064_v61 = vpack.c.bf16 %v4482_v41, %v4480_v40 }
0x198e   :  { %3689 = vmax.xlane.f32.xlu1 %v3688_v43  ;;  %v4481_v43 = vld [vmem:[%s6325_s4 + $0xd0] sm:$0xff] }
0x199f   :  { %3783 = vrot.lane.b32.xlu1 %v5900_v20, %s5260_s0 }
0x19e5   :  { %v3699_v7 = vpop.xlane.xlu0 %3698 }
0x1a1b   :  { %v3690_v44 = vpop.xlane.xlu1 %3689 }
0x1a1c   :  { %v3692_v62 = vsub.f32 %v3684_v42, %v3690_v44  ;;  %v4479_v42 = vld [vmem:[%s6325_s4 + $0xc0] sm:$0xff] }
0x1a1d   :  { %v5066_v44 = vpack.c.bf16 %v4481_v43, %v4479_v42 }
0x1a1e   :  { %v3695_v46 = vmul.f32 1.442695, %v3692_v62  ;;  %v4484_v62 = vld [vmem:[%s6325_s4 + $0xe8] sm:$0xff] }
0x1a1f   :  { %v3784_v52 = vpop.permute.xlu1 %3783 }
0x1a20   :  { %5214 = vpow2.f32 %v3695_v46  ;;  %4914 = vmatpush3.msra.mxu1 %v3784_v52  ;;  %v4486_v46 = vld [vmem:[%s6325_s4 + $0xf8] sm:$0xff]  ;;  %v4483_v52 = vld [vmem:[%s6325_s4 + $0xe0] sm:$0xff] }
0x1a21   :  { %5216 = vrcp.f32 %v3699_v7 }
0x1a2a   :  { %v5215_v53 = vpop.eup %5214 }
0x1a2b   :  { %v3700_v54 = vsel %vm356_vm4, %v5215_v53, 0.0  ;;  %v5217_v56 = vpop.eup %5216 }
0x1a2c   :  { %3701 = vadd.xlane.f32.xlu0 %v3700_v54  ;;  %v3705_v2 = vmul.f32 %v5217_v56, %v5213_v1  ;;  %v4477_v1 = vld [vmem:[%s6325_s4 + $0xb0] sm:$0xff]  ;;  %v4507_v56 = vld [vmem:[%s6326_s5 + $0x188] sm:$0xff] }
0x1a2d   :  { %v5062_v63 = vpack.c.bf16 %v4477_v1, %v4475_v48  ;;  %v4485_v54 = vld [vmem:[%s6325_s4 + $0xf0] sm:$0xff] }
0x1a2e   :  { %v5070_v7 = vpack.c.bf16 %v4485_v54, %v4483_v52 }
0x1a42   :  { %3707 = vrot.lane.b32.xlu0 %v5892_v17, %s5260_s0  ;;  %v4435_v17 = vld [vmem:[%s6324_s3 + $0x70] sm:$0xff] }
0x1a43   :  { %v5052_v10 = vpack.c.bf16 %v4436_v9, %v4435_v17  ;;  %v4509_v17 = vld [vmem:[%s6326_s5 + $0x198] sm:$0xff] }
0x1a45   :  { %5053 = vmatprep.subr.bf16.mxu1 %v5052_v10 }
0x1ab9   :  { %v3702_v55 = vpop.xlane.xlu0 %3701 }
0x1aba   :  { %5218 = vrcp.f32 %v3702_v55  ;;  %v4506_v55 = vld [vmem:[%s6326_s5 + $0x180] sm:$0xff] }
0x1abd   :  { %v3708_v20 = vpop.permute.xlu0 %3707 }
0x1abe   :  { %4909 = vmatpush3.msra.mxu0 %v3708_v20  ;;  %v5072_v20 = vpack.c.bf16 %v4507_v56, %v4506_v55 }
0x1abf   :  { %4911 = vmatmul.mubr.msk.f32.vlgmr.msra.gmra.mrb[46].mxu0 %vm356_vm4, %v3705_v2  ;;  %5057 = vmatprep.subr.bf16.mxu0 %v5056_v35  ;;  %v4490_v2 = vld [vmem:[%s6326_s5 + $0x100] sm:$0xff]  ;;  %v4517_v35 = vld [vmem:[%s6326_s5 + $0x1d8] sm:$0xff] }
0x1ac0   :  { %4088 = vmatprep.mubr.f32.mxu0 %v5252_v33  ;;  %5059 = vmatpush1.bf16.msra.mxu0 %v5058_v38  ;;  %v5092_v37 = vpack.c.bf16 %v4517_v35, %v4516_v34  ;;  %v4500_v38 = vld [vmem:[%s6326_s5 + $0x150] sm:$0xff] }
0x1ac1   :  { %5061 = vmatprep.subr.bf16.mxu0 %v5060_v0  ;;  %v4519_v0 = vld [vmem:[%s6326_s5 + $0x1e8] sm:$0xff]  ;;  %v5094_v48 = vpack.c.bf16 %v4501_v60, %v4500_v38 }
0x1ac2   :  { %v5096_v1 = vpack.c.bf16 %v4519_v0, %v4518_v39 }
0x1ac4   :  { %v5219_v6 = vpop.eup %5218  ;;  %5063 = vmatpush1.bf16.msra.mxu0 %v5062_v63 }
0x1ac5   :  { %v3706_v8 = vmul.f32 %v5219_v6, %v5215_v53  ;;  %5065 = vmatprep.subr.bf16.mxu0 %v5064_v61  ;;  %v5068_v53 = vpack.c.bf16 %v4486_v46, %v4484_v62  ;;  %v4491_v6 = vld [vmem:[%s6326_s5 + $0x108] sm:$0xff]  ;;  %v3979_v62 = vrot.slane %v5877_v5, %v1893_v28  ;;  %v4502_v28 = vld [vmem:[%s6326_s5 + $0x160] sm:$0xff] }
0x1ac6   :  { %v5074_v9 = vpack.c.bf16 %v4491_v6, %v4490_v2 }
0x1ac7   :  { %4916 = vmatmul.mubr.msk.f32.vlgmr.msra.gmra.mrb[34].mxu1 %vm356_vm4, %v3706_v8  ;;  %v4508_v8 = vld [vmem:[%s6326_s5 + $0x190] sm:$0xff] }
0x1ac8   :  { %5055 = vmatpush3.bf16.msra.mxu1 %v5052_v10  ;;  %5067 = vmatpush1.bf16.msra.mxu0 %v5066_v44  ;;  %v5076_v10 = vpack.c.bf16 %v4509_v17, %v4508_v8  ;;  %v4487_v8 = vld [vmem:[%s6328_s7 + $0x2] sm:$0x3] }
0x1ac9   :  { %5069 = vmatprep.subr.bf16.mxu0 %v5068_v53  ;;  %5073 = vmatprep.subr.bf16.mxu1 %v5072_v20  ;;  %v3985_v53 = vrot.slane %v5877_v5, %v1899_v29  ;;  %v5098_v29 = vpack.c.bf16 %v4503_v45, %v4502_v28  ;;  %v4520_v5 = vld [vmem:[%s6326_s5 + $0x1f0] sm:$0xff]  ;;  %v4505_v20 = vld [vmem:[%s6326_s5 + $0x178] sm:$0xff]  ;;  %v4011_v17 = vrot.slane %v4487_v8, %v5396_v47 }
0x1acc   :  { %5071 = vmatpush1.bf16.msra.mxu0 %v5070_v7 }
0x1b92   :  { %v3779_v11 = vpop.f32.mrb[46].mxu0 }
0x1b93   :  { %v4912_v12 = vpop.f32.mrb[47].mxu0  ;;  %4922 = vmatprep.mubr.msk.f32.mxu1 %vm198_vm2, %v3779_v11  ;;  %v4492_v11 = vld [vmem:[%s6326_s5 + $0x110] sm:$0xff] }
0x1b94   :  { %v4493_v12 = vld [vmem:[%s6326_s5 + $0x118] sm:$0xff] }
0x1b9a   :  { %v3855_v59 = vpop.f32.mrb[34].mxu1 }
0x1b9b   :  { %v4917_v4 = vpop.f32.mrb[35].mxu1  ;;  %4923 = vmatmul.mubr.msk.f32.vlgmr.msra.gmra.mrb[28].mxu1 %vm198_vm2, %v3855_v59  ;;  %v4510_v59 = vld [vmem:[%s6326_s5 + $0x1a0] sm:$0xff] }
0x1b9c   :  { %v4511_v4 = vld [vmem:[%s6326_s5 + $0x1a8] sm:$0xff]  ;;  %5075 = vmatpush3.bf16.msra.mxu1 %v5074_v9  ;;  %v4015_v9 = vrot.slane %v4487_v8, %v5404_v49 }
0x1b9d   :  { %5077 = vmatprep.subr.bf16.mxu1 %v5076_v10 }
0x1c6e   :  { %v4924_v50 = vpop.f32.mrb[28].mxu1 }
0x1c6f   :  { %v3943_v3 = vadd.f32 %v4924_v50, %v5817_v19  ;;  %v3931_v51 = vpop.f32.mrb[29].mxu1  ;;  %v5080_v50 = vpack.c.bf16 %v4511_v4, %v4510_v59 }
0x1c70   :  { %v3942_v21 = vadd.f32 %v3931_v51, %v5812_v15  ;;  %v4495_v51 = vld [vmem:[%s6326_s5 + $0x128] sm:$0xff] }
0x1c71   :  { %v6086_v58 = vadd.f32 %v3947_v14, %v3943_v3  ;;  %v4494_v3 = vld [vmem:[%s6326_s5 + $0x120] sm:$0xff] }
0x1c72   :  { %v6088_v22 = vadd.f32 %v3947_v14, %v3942_v21  ;;  %v5078_v14 = vpack.c.bf16 %v4493_v12, %v4492_v11  ;;  %v4512_v21 = vld [vmem:[%s6326_s5 + $0x1b0] sm:$0xff] }
0x1c73   :  { %v3953_v23 = vsel %vm72_vm0, %v6086_v58, 0.0 }
0x1c74   :  { %3954 = vadd.xlane.f32.xlu0 %v3953_v23  ;;  %v3950_v24 = vsel %vm72_vm0, %v6088_v22, 0.0  ;;  %v4513_v23 = vld [vmem:[%s6326_s5 + $0x1b8] sm:$0xff]  ;;  %5079 = vmatpush3.bf16.msra.mxu1 %v5078_v14 }
0x1c75   :  { %3951 = vadd.xlane.f32.xlu1 %v3950_v24  ;;  %v5082_v24 = vpack.c.bf16 %v4495_v51, %v4494_v3  ;;  %5081 = vmatprep.subr.bf16.mxu1 %v5080_v50 }
0x1c78   :  { %5083 = vmatpush3.bf16.msra.mxu1 %v5082_v24 }
0x1d01   :  { %v3955_v25 = vpop.xlane.xlu0 %3954 }
0x1d02   :  { %v3957_v18 = vmul.f32 0.015625, %v3955_v25  ;;  %v3952_v57 = vpop.xlane.xlu1 %3951  ;;  %v5084_v25 = vpack.c.bf16 %v4513_v23, %v4512_v21 }
0x1d03   :  { %v3956_v26 = vmul.f32 0.015625, %v3952_v57  ;;  %v4497_v57 = vld [vmem:[%s6326_s5 + $0x138] sm:$0xff] }
0x1d04   :  { %v6095_v19 = vsub.f32 %v6086_v58, %v3957_v18  ;;  %v4496_v18 = vld [vmem:[%s6326_s5 + $0x130] sm:$0xff]  ;;  %5085 = vmatprep.subr.bf16.mxu1 %v5084_v25 }
0x1d05   :  { %v6098_v15 = vsub.f32 %v6088_v22, %v3956_v26  ;;  %v4514_v26 = vld [vmem:[%s6326_s5 + $0x1c0] sm:$0xff] }
0x1d06   :  { %v3961_v27 = vmul.f32 %v6095_v19, %v6095_v19 }
0x1d07   :  { %v3960_v30 = vmul.f32 %v6098_v15, %v6098_v15 }
0x1d08   :  { %v3965_v31 = vsel %vm72_vm0, %v3961_v27, 0.0  ;;  %v4515_v27 = vld [vmem:[%s6326_s5 + $0x1c8] sm:$0xff] }
0x1d09   :  { %3966 = vadd.xlane.f32.xlu1 %v3965_v31  ;;  %v3962_v32 = vsel %vm72_vm0, %v3960_v30, 0.0  ;;  %v5086_v30 = vpack.c.bf16 %v4497_v57, %v4496_v18  ;;  %v5088_v31 = vpack.c.bf16 %v4515_v27, %v4514_v26  ;;  %v4218_v57 = vrot.slane %v6080_v13, %v5404_v49 }
0x1d0a   :  { %3963 = vadd.xlane.f32.xlu0 %v3962_v32  ;;  %v4498_v32 = vld [vmem:[%s6326_s5 + $0x140] sm:$0xff] }
0x1d0b   :  { %5087 = vmatpush3.bf16.msra.mxu1 %v5086_v30  ;;  %v5090_v36 = vpack.c.bf16 %v4499_v16, %v4498_v32 }
0x1d0c   :  { %5089 = vmatprep.subr.bf16.mxu1 %v5088_v31 }
0x1d0f   :  { %5091 = vmatpush3.bf16.msra.mxu1 %v5090_v36 }
0x1d10   :  { %5093 = vmatprep.subr.bf16.mxu1 %v5092_v37 }
0x1d13   :  { %5095 = vmatpush3.bf16.msra.mxu1 %v5094_v48 }
0x1d14   :  { %5097 = vmatprep.subr.bf16.mxu1 %v5096_v1  ;;  %v4261_v1 = vld [vmem:[%s6330_s9] sm:$0xff] }
0x1d17   :  { %5099 = vmatpush3.bf16.msra.mxu1 %v5098_v29  ;;  %v4522_v29 = vld [vmem:[%s6329_s8] ss:$0 sm:$0xff] }
0x1d96   :  { %v3967_v63 = vpop.xlane.xlu1 %3966 }
0x1d97   :  { %v3969_v40 = vmul.f32 0.015625, %v3967_v63  ;;  %v3964_v41 = vpop.xlane.xlu0 %3963  ;;  %v4262_v63 = vld [vmem:[%s6330_s9 + $0x8] sm:$0xff] }
0x1d98   :  { %v3968_v61 = vmul.f32 0.015625, %v3964_v41  ;;  %v4263_v41 = vld [vmem:[%s6330_s9 + $0x10] sm:$0xff] }
0x1d99   :  { %v3971_v42 = vadd.f32 1e-05, %v3969_v40  ;;  %v5104_v40 = vpack.c.bf16 %v4262_v63, %v4261_v1 }
0x1d9a   :  { %v3970_v43 = vadd.f32 1e-05, %v3968_v61  ;;  %v4264_v61 = vld [vmem:[%s6330_s9 + $0x18] sm:$0xff] }
0x1d9b   :  { %5220 = vrsqrt.f32 %v3971_v42  ;;  %5105 = vmatprep.subr.bf16.mxu0 %v5104_v40  ;;  %v5108_v42 = vpack.c.bf16 %v4264_v61, %v4263_v41 }
0x1d9c   :  { %5222 = vrsqrt.f32 %v3970_v43  ;;  %v4265_v43 = vld [vmem:[%s6330_s9 + $0x20] sm:$0xff] }
0x1da5   :  { %v5221_v44 = vpop.eup %5220 }
0x1da6   :  { %v5223_v46 = vpop.eup %5222  ;;  %v3975_v54 = vmul.f32 %v5221_v44, %v6095_v19  ;;  %v4266_v44 = vld [vmem:[%s6330_s9 + $0x28] sm:$0xff] }
0x1da7   :  { %v3974_v52 = vmul.f32 %v5223_v46, %v6098_v15  ;;  %v4504_v15 = vld [vmem:[%s6326_s5 + $0x170] sm:$0xff] }
0x1da8   :  { %v3981_v56 = vmul.f32 %v3979_v62, %v3975_v54  ;;  %v5102_v6 = vpack.c.bf16 %v4505_v20, %v4504_v15  ;;  %v4267_v46 = vld [vmem:[%s6330_s9 + $0x30] sm:$0xff] }
0x1da9   :  { %v3980_v7 = vmul.f32 %v3979_v62, %v3974_v52  ;;  %v5112_v62 = vpack.c.bf16 %v4266_v44, %v4265_v43  ;;  %v4268_v52 = vld [vmem:[%s6330_s9 + $0x38] sm:$0xff] }
0x1daa   :  { %v3987_v2 = vadd.f32 %v3985_v53, %v3981_v56 }
0x1dab   :  { %v3986_v55 = vadd.f32 %v3985_v53, %v3980_v7  ;;  %v5116_v53 = vpack.c.bf16 %v4268_v52, %v4267_v46 }
0x1dad   :  { %4488 = vmatmul.mubr.msk.f32.vlgmr.msra.gmra.mrb[48].mxu0 %vm72_vm0, %v3986_v55 }
0x1dae   :  { %4094 = vmatprep.mubr.f32.mxu0 %v5252_v33  ;;  %v4521_v33 = vld [vmem:[%s6326_s5 + $0x1f8] sm:$0xff]  ;;  %5107 = vmatpush3.bf16.msra.mxu0 %v5104_v40 }
0x1daf   :  { %v5100_v19 = vpack.c.bf16 %v4521_v33, %v4520_v5  ;;  %5109 = vmatprep.subr.bf16.mxu0 %v5108_v42  ;;  %v4523_v33 = vld [vmem:[%s6329_s8 + $0x1] ss:$0 sm:$0xff]  ;;  %s5228_s8 = scalar_lea.vmem %s4365_s19, 256 }
0x1db0   :  { %p5229_p0 = scmp.ne.s32.totalorder %s4365_s19, %s5228_s8  ;;  %p5234_p2 = scmp.lt.s32.totalorder %s5228_s8, %s5228_s8 }
0x1db1   :  { %4489 = vmatmul.mubr.msk.f32.gmra.mrb[50].mxu0 %vm72_vm0, %v3987_v2  ;;  %5101 = vmatprep.subr.bf16.mxu1 %v5100_v19 }
0x1db2   :  { %5103 = vmatpush3.bf16.msra.mxu1 %v5102_v6  ;;  %5111 = vmatpush3.bf16.msra.mxu0 %v5108_v42  ;;  %p5235_p3 = por %p5234_p2, %p5233_p1 }
0x1db3   :  { %5113 = vmatprep.subr.bf16.mxu0 %v5112_v62 }
0x1db4   :  { %p5236_p4 = pnand %p5235_p3, %p5229_p0 }
0x1db6   :  { %5115 = vmatpush3.bf16.msra.mxu0 %v5112_v62 }
0x1db7   :  { %5117 = vmatprep.subr.bf16.mxu0 %v5116_v53 }
0x1dba   :  { %5119 = vmatpush3.bf16.msra.mxu0 %v5116_v53 }
0x1e80   :  { %v4090_v10 = vpop.f32.mrb[48].mxu0 }
0x1e81   :  { %v4091_v11 = vadd.f32 %v4090_v10, %v4011_v17  ;;  %v4092_v12 = vpop.f32.mrb[49].mxu0 }
0x1e82   :  { %v4093_v59 = vadd.f32 %v4092_v12, %v4015_v9 }
0x1e83   :  { %v4101_v50 = vmax.f32 %v4091_v11, 0.0 }
0x1e84   :  { %v4102_v4 = vmax.f32 %v4093_v59, 0.0  ;;  %v4096_v14 = vpop.f32.mrb[50].mxu0 }
0x1e85   :  { %v4097_v3 = vadd.f32 %v4096_v14, %v4011_v17  ;;  %v4098_v51 = vpop.f32.mrb[51].mxu0 }
0x1e86   :  { %v4099_v21 = vadd.f32 %v4098_v51, %v4015_v9  ;;  %4202 = vmatprep.mubr.f32.mxu1 %v4102_v4  ;;  %v4524_v9 = vld [vmem:[%s6331_s10] ss:$0 sm:$0xff] }
0x1e87   :  { %4203 = vmatmul.mubr.f32.vlgmr.msra.gmra.mrb[36].mxu1 %v4101_v50  ;;  %v4103_v24 = vmax.f32 %v4097_v3, 0.0 }
0x1e88   :  { %v4104_v23 = vmax.f32 %v4099_v21, 0.0 }
0x1e8a   :  { %4207 = vmatprep.mubr.f32.mxu1 %v4104_v23 }
0x1e8b   :  { %4208 = vmatmul.mubr.f32.gmra.mrb[38].mxu1 %v4103_v24 }
0x1f5a   :  { %v4693_v25 = vpop.f32.mrb[36].mxu1 }
0x1f5b   :  { %v4694_v47 = vpop.f32.mrb[37].mxu1 }
0x1f5c   :  { %v4695_v18 = vadd.f32 %v4694_v47, %v4693_v25 }
0x1f5e   :  { %v4213_v26 = vadd.f32 %v4695_v18, %v6088_v22  ;;  %v4696_v27 = vpop.f32.mrb[38].mxu1 }
0x1f5f   :  { %v4697_v30 = vpop.f32.mrb[39].mxu1 }
0x1f60   :  { %v4698_v31 = vadd.f32 %v4697_v30, %v4696_v27  ;;  %v4219_v32 = vadd.f32 %v4218_v57, %v4213_v26 }
0x1f62   :  { %v4214_v16 = vadd.f32 %v4698_v31, %v6086_v58  ;;  %v4223_v34 = vsel %vm72_vm0, %v4219_v32, 0.0 }
0x1f63   :  { %4224 = vadd.xlane.f32.xlu0 %v4223_v34 }
0x1f64   :  { %v4220_v35 = vadd.f32 %v4218_v57, %v4214_v16 }
0x1f66   :  { %v4226_v36 = vsel %vm72_vm0, %v4220_v35, 0.0 }
0x1f67   :  { %4227 = vadd.xlane.f32.xlu1 %v4226_v36 }
0x1ff0   :  { %v4225_v37 = vpop.xlane.xlu0 %4224 }
0x1ff1   :  { %v4229_v38 = vmul.f32 0.015625, %v4225_v37 }
0x1ff3   :  { %v4231_v60 = vsub.f32 %v4219_v32, %v4229_v38 }
0x1ff4   :  { %v4228_v39 = vpop.xlane.xlu1 %4227 }
0x1ff5   :  { %v4230_v49 = vmul.f32 0.015625, %v4228_v39  ;;  %v4233_v13 = vmul.f32 %v4231_v60, %v4231_v60 }
0x1ff7   :  { %v4232_v22 = vsub.f32 %v4220_v35, %v4230_v49  ;;  %v4235_v0 = vsel %vm72_vm0, %v4233_v13, 0.0 }
0x1ff8   :  { %4236 = vadd.xlane.f32.xlu0 %v4235_v0 }
0x1ff9   :  { %v4234_v48 = vmul.f32 %v4232_v22, %v4232_v22 }
0x1ffb   :  { %v4238_v58 = vsel %vm72_vm0, %v4234_v48, 0.0 }
0x1ffc   :  { %4239 = vadd.xlane.f32.xlu1 %v4238_v58 }
0x2085   :  { %v4237_v54 = vpop.xlane.xlu0 %4236 }
0x2086   :  { %v4241_v7 = vmul.f32 0.015625, %v4237_v54 }
0x2088   :  { %v4243_v55 = vadd.f32 1e-05, %v4241_v7 }
0x2089   :  { %v4240_v56 = vpop.xlane.xlu1 %4239 }
0x208a   :  { %5224 = vrsqrt.f32 %v4243_v55  ;;  %v4242_v2 = vmul.f32 0.015625, %v4240_v56 }
0x208c   :  { %v4244_v28 = vadd.f32 1e-05, %v4242_v2 }
0x208e   :  { %5226 = vrsqrt.f32 %v4244_v28 }
0x2094   :  { %v5225_v45 = vpop.eup %5224 }
0x2095   :  { %v4247_v5 = vmul.f32 %v5225_v45, %v4231_v60 }
0x2097   :  { %v4253_v19 = vmul.f32 %v4522_v29, %v4247_v5 }
0x2098   :  { %v5227_v15 = vpop.eup %5226 }
0x2099   :  { %v4248_v20 = vmul.f32 %v5227_v15, %v4232_v22  ;;  %v4259_v6 = vadd.f32 %v4523_v33, %v4253_v19 }
0x209b   :  { %v4254_v8 = vmul.f32 %v4522_v29, %v4248_v20  ;;  %4941 = vmatprep.mubr.msk.f32.mxu0 %vm72_vm0, %v4259_v6 }
0x209d   :  { %v4260_v17 = vadd.f32 %v4523_v33, %v4254_v8 }
0x209f   :  { %4942 = vmatmul.mubr.msk.f32.vlgmr.msra.gmra.mrb[52].mxu0 %vm72_vm0, %v4260_v17 }
0x2172   :  { %v4943_v10 = vpop.f32.mrb[52].mxu0 }
0x2173   :  { %v4354_v11 = vadd.f32 %v4943_v10, %v4524_v9  ;;  %v4348_v12 = vpop.f32.mrb[53].mxu0 }
0x2174   :  { %v4349_v59 = vadd.f32 %v4524_v9, %v4348_v12 }
0x2175   :  { %4358 = vst [vmem:[#allocation2 + $0x8] sm:$0xff] %v4354_v11 }
0x2176   :  { %4357 = vst [vmem:[#allocation2] sm:$0xff] %v4349_v59 }
0x2177   :  { %5239 = shalt.err (!%p5236_p4)
}
0x2178   :  { %s5240_s10 = scalar_lea.hbm %s6332_s11, 256 }
0x2179   :  { %p5241_p5 = scmp.ne.s32.totalorder %s6332_s11, %s5240_s10  ;;  %p5244_p6 = scmp.lt.u32.totalorder %s5240_s10, %s6332_s11 }
0x217b   :  { %p5246_p7 = pnand %p5244_p6, %p5241_p5 }
0x217d   :  { %5249 = shalt.err (!%p5246_p7)
}
0x217e   :  { %s5262_s23 = smov 128   ;;  %s5263_s3 = smov 8  }
0x217f   :  { %4370 = dma.vmem_to_hbm [thread:$0]  %s4365_s19, 256, %s6332_s11, [#allocation3], %s5262_s23, %s5262_s23, %s5263_s3  }
0x2180   :  { %5250 = dma.done.wait [#allocation3], 256  }
0x2181   :  { %5251 = vsyncadd [#allocation3], 4294967040 }
0x2182   :  { %4374 = vsyncpa [#allocation3], 1 }

</bundles_post_ra>
